<compile_context>
chip_gen: v7x
topology: tpu7x:2x2x1
jax: 0.10.0
libtpu: 0.0.40
codegen_flags: <defaults>
</compile_context>

<pallas_src>
import functools

import jax
import jax.numpy as jnp
from jax.experimental import pallas as pl
from jax.experimental.pallas import tpu as pltpu


def _round_up(n, m):
    return ((n + m - 1) // m) * m


# ------------------------------------------------------------------ fused two-head kernel

def _fused_heads_kernel(*refs, num_layers, compute_dtype):
    """refs = (x, w0, b0, ..., w_{L-1}, b_{L-1}, epi, out), all already head-selected.

    x: (tm, D0); w_l: (D_l, D_{l+1}) pre-transposed (per-head sigmoid scale folded into the
    last layer); b_l: (1, D_{l+1}) f32; epi: (2, D_L) f32 [scale_vec; round_mask]; out: (tm, D_L).
    """
    x_ref = refs[0]
    o_ref = refs[-1]
    epi_ref = refs[-2]

    h = x_ref[...].astype(compute_dtype)
    for l in range(num_layers):
        w_ref = refs[1 + 2 * l]
        b_ref = refs[2 + 2 * l]
        acc = jnp.dot(h, w_ref[...], preferred_element_type=jnp.float32)
        acc = acc + b_ref[...]                       # (1, D_out) f32, broadcasts over rows
        if l < num_layers - 1:
            h = jnp.maximum(acc, 0.0).astype(compute_dtype)
        else:
            h = acc                                  # final layer: no ReLU, keep f32

    # sigmoid(scale * hh): the per-head scale is already folded into the last layer's params.
    z = jnp.clip(h, -30.0, 30.0)                     # saturation region; keeps exp finite below
    denom = 1.0 + jnp.exp(-z)                        # EUP exp
    r = pl.reciprocal(denom, approx=True)            # EUP approx reciprocal (off the VALU path)
    r = r * (2.0 - denom * r)                        # one Newton step -> ~f32 accuracy, 2 VALU ops

    epi = epi_ref[...]
    scale = epi[0:1, :]                              # kp: [W, H, 0, ...]   f: unused
    mask = epi[1:2, :]                               # kp: ones             f: zeros
    out = mask * jnp.round(r * scale) + (1.0 - mask) * r
    o_ref[...] = out.astype(o_ref.dtype)


def _pick_tm(m, d_in_pad, d_out_pad, in_itemsize, out_itemsize, max_tm=512,
             act_budget_bytes=8 << 20):
    """Row-tile size: multiple of 8, big enough to amortize per-step overhead, small enough
    that double-buffered activation tiles stay far under scoped VMEM (v5e 16 MiB default)."""
    tm = _round_up(min(max_tm, _round_up(m, 8)), 8)
    while tm > 8 and 2 * tm * (d_in_pad * in_itemsize + d_out_pad * out_itemsize) > act_budget_bytes:
        tm = max(8, _round_up(tm // 2, 8))
    return tm


def _fused_heads_pallas(x, weights, biases, epi, *, tm, out_dtype):
    n_heads, m_pad, d_in_pad = x.shape
    d_out_pad = weights[-1].shape[2]
    num_layers = len(weights)
    compute_dtype = jnp.dtype(weights[0].dtype)

    # Activation tiles stream over the row grid axis; weights/biases/epilogue only depend on the
    # head axis, so they stay VMEM-resident for a whole head's row sweep.
    in_specs = [pl.BlockSpec((None, tm, d_in_pad), lambda h, i: (h, i, 0))]
    args = [x]
    for w, b in zip(weights, biases):
        in_specs.append(pl.BlockSpec((None,) + w.shape[1:], lambda h, i: (h, 0, 0)))
        in_specs.append(pl.BlockSpec((None,) + b.shape[1:], lambda h, i: (h, 0, 0)))
        args += [w, b]
    in_specs.append(pl.BlockSpec((None,) + epi.shape[1:], lambda h, i: (h, 0, 0)))
    args.append(epi)

    flops = 2 * n_heads * m_pad * sum(int(w.shape[1]) * int(w.shape[2]) for w in weights)
    transcendentals = n_heads * m_pad * d_out_pad
    bytes_accessed = int(
        sum(a.size * a.dtype.itemsize for a in args)
        + n_heads * m_pad * d_out_pad * jnp.dtype(out_dtype).itemsize)

    kernel = functools.partial(_fused_heads_kernel,
                               num_layers=num_layers, compute_dtype=compute_dtype)

    return pl.pallas_call(
        kernel,
        out_shape=jax.ShapeDtypeStruct((n_heads, m_pad, d_out_pad), out_dtype),
        grid=(n_heads, m_pad // tm),
        in_specs=in_specs,
        out_specs=pl.BlockSpec((None, tm, d_out_pad), lambda h, i: (h, i, 0)),
        compiler_params=pltpu.CompilerParams(
            # Both axes are independent; head axis (size 2) gives v7x's two TensorCores one
            # MLP head each even when the row grid collapses to a single block.
            dimension_semantics=("parallel", "parallel")),
        cost_estimate=pl.CostEstimate(
            flops=int(flops),
            transcendentals=int(transcendentals),
            bytes_accessed=bytes_accessed),
    )(*args)


# ------------------------------------------------------------------ params & wrappers

def init_mlp_params(key, input_dim, hidden_dim, output_dim, num_layers):
    """PyTorch-convention params: [(W (out,in), b (out,)), ...], nn.Linear default init."""
    h = [hidden_dim] * (num_layers - 1)
    dims_in = [input_dim] + h
    dims_out = h + [output_dim]
    params = []
    for n, k in zip(dims_in, dims_out):
        key, kw, kb = jax.random.split(key, 3)
        bound = 1.0 / jnp.sqrt(jnp.float32(n))
        w = jax.random.uniform(kw, (k, n), jnp.float32, -bound, bound)
        b = jax.random.uniform(kb, (k,), jnp.float32, -bound, bound)
        params.append((w, b))
    return params


def prepare_head_params(params_kp, params_f, *, compute_dtype=jnp.bfloat16,
                        sigmoid_scale_kp=10.0, sigmoid_scale_f=1.0):
    """ONE-TIME kernel prep (do NOT repeat per forward).

    Per layer: transpose both heads' weights to (D_in, D_out), zero-pad feature dims to
    multiples of 128, stack into (2, D_in_pad, D_out_pad); biases -> (2, 1, D_out_pad) f32.
    The per-head sigmoid scale is folded into the final layer's W/b so the kernel's epilogue
    is scale-free.  Default compute dtype bf16 (f32 MXU accumulation, f32 biases).
    """
    assert len(params_kp) == len(params_f), "heads must have the same number of layers"
    num_layers = len(params_kp)
    weights, biases = [], []
    for l, ((w_kp, b_kp), (w_f, b_f)) in enumerate(zip(params_kp, params_f)):
        if l == num_layers - 1:   # fold sigmoid scales: sigmoid(s*(xW+b)) == sigmoid(x(sW)+sb)
            w_kp, b_kp = w_kp * sigmoid_scale_kp, b_kp * sigmoid_scale_kp
            w_f, b_f = w_f * sigmoid_scale_f, b_f * sigmoid_scale_f
        din_pad = _round_up(max(w_kp.shape[1], w_f.shape[1]), 128)
        dout_pad = _round_up(max(w_kp.shape[0], w_f.shape[0]), 128)
        w_stack = jnp.zeros((2, din_pad, dout_pad), compute_dtype)
        w_stack = w_stack.at[0, :w_kp.shape[1], :w_kp.shape[0]].set(w_kp.T.astype(compute_dtype))
        w_stack = w_stack.at[1, :w_f.shape[1], :w_f.shape[0]].set(w_f.T.astype(compute_dtype))
        b_stack = jnp.zeros((2, 1, dout_pad), jnp.float32)
        b_stack = b_stack.at[0, 0, :b_kp.shape[0]].set(b_kp.astype(jnp.float32))
        b_stack = b_stack.at[1, 0, :b_f.shape[0]].set(b_f.astype(jnp.float32))
        weights.append(w_stack)
        biases.append(b_stack)
    return {"weights": weights, "biases": biases,
            "d_out_kp": params_kp[-1][0].shape[0],
            "d_out_f": params_f[-1][0].shape[0]}


def detr4kpnf_head_forward(h_kp, h_f, prep, my_height, my_width, *, max_tm=512):
    """Pallas path for the DETR4kpNf head: both MLPs, their sigmoids and the scale/round
    epilogue fused into ONE pallas_call.  Only two slices + two transposes remain in JAX."""
    assert h_kp.shape[:2] == h_f.shape[:2] and h_kp.shape[-1] == h_f.shape[-1]
    T, N, E = h_kp.shape
    m = T * N
    weights, biases = prep["weights"], prep["biases"]
    d_in_pad = weights[0].shape[1]
    d_out_pad = weights[-1].shape[2]
    # kp holds pixel indices up to W/H -> keep the kernel output in f32 regardless of compute dtype.
    out_dtype = jnp.float32
    tm = _pick_tm(m, d_in_pad, d_out_pad, jnp.dtype(h_kp.dtype).itemsize,
                  jnp.dtype(out_dtype).itemsize, max_tm)
    m_pad = _round_up(m, tm)

    # Stack the two heads' activations -> (2, m_pad, d_in_pad).
    x = jnp.stack([h_kp.reshape(m, E), h_f.reshape(m, E)], axis=0)
    x = jnp.pad(x, ((0, 0), (0, m_pad - m), (0, d_in_pad - E)))

    # Per-head epilogue vectors: row 0 = post-sigmoid scale, row 1 = round mask.  Built from
    # host scalars, so XLA constant-folds this when H/W are static.
    epi = jnp.zeros((2, 2, d_out_pad), jnp.float32)
    epi = epi.at[0, 0, 0].set(my_width)
    epi = epi.at[0, 0, 1].set(my_height)
    epi = epi.at[0, 1, :].set(1.0)    # kp head: out = round(sigmoid * scale)
    epi = epi.at[1, 0, :].set(1.0)    # f head: scale unused (mask == 0) -> out = sigmoid

    out = _fused_heads_pallas(x, weights, biases, epi, tm=tm, out_dtype=out_dtype)

    kp = out[0, :m, :prep["d_out_kp"]].reshape(T, N, prep["d_out_kp"])
    desc = out[1, :m, :prep["d_out_f"]].reshape(T, N, prep["d_out_f"])
    return jnp.transpose(kp, (1, 0, 2)), jnp.transpose(desc, (1, 0, 2))


# ------------------------------------------------------------------ plain-JAX references

def _mlp_reference(x, params):
    h = x
    for i, (w, b) in enumerate(params):
        h = jnp.dot(h, w.T, precision=jax.lax.Precision.HIGHEST) + b
        if i < len(params) - 1:
            h = jnp.maximum(h, 0.0)
    return h


def detr4kpnf_head_reference(h_kp, h_f, params_kp, params_f, my_height, my_width):
    """fp32 reference matching the PyTorch module's formulas exactly."""
    hh_kp = _mlp_reference(h_kp, params_kp)
    hh_f = _mlp_reference(h_f, params_f)
    desc = 1.0 / (1.0 + jnp.exp(-1.0 * hh_f))
    kp = 1.0 / (1.0 + jnp.exp(-10.0 * hh_kp))
    kp = kp.at[:, :, 0].set(jnp.round(kp[:, :, 0] * my_width))
    kp = kp.at[:, :, 1].set(jnp.round(kp[:, :, 1] * my_height))
    return jnp.transpose(kp, (1, 0, 2)), jnp.transpose(desc, (1, 0, 2))


def detr4kpnf_head_reference_prep(h_kp, h_f, prep, my_height, my_width):
    """Reference that consumes the SAME prepared (padded / transposed / scale-folded / cast)
    weights as the kernel, so a comparison isolates the kernel plumbing from dtype choices."""
    cdt = prep["weights"][0].dtype
    num_layers = len(prep["weights"])
    outs = []
    for head, x in enumerate((h_kp, h_f)):
        T, N, e = x.shape
        h = jnp.pad(x.reshape(T * N, e), ((0, 0), (0, prep["weights"][0].shape[1] - e)))
        h = h.astype(cdt)
        for l in range(num_layers):
            acc = jnp.dot(h, prep["weights"][l][head],
                          preferred_element_type=jnp.float32) + prep["biases"][l][head]
            h = jnp.maximum(acc, 0.0).astype(cdt) if l < num_layers - 1 else acc
        outs.append(1.0 / (1.0 + jnp.exp(-jnp.clip(h, -30.0, 30.0))).reshape(T, N, -1))
    kp_prob = outs[0][:, :, :prep["d_out_kp"]]
    kp = jnp.stack([jnp.round(kp_prob[..., 0] * my_width),
                    jnp.round(kp_prob[..., 1] * my_height)], axis=-1)
    desc = outs[1][:, :, :prep["d_out_f"]]
    return jnp.transpose(kp, (1, 0, 2)), jnp.transpose(desc, (1, 0, 2))


if __name__ == "__main__":
    key = jax.random.PRNGKey(0)
    k_kp, k_f, k_pkp, k_pf = jax.random.split(key, 4)

    # Shapes consistent with DETR4kpNf: hidden_dim E=256, num_voters T=8, batch N=2.
    T, N, E = 8, 2, 256
    my_height, my_width = 480.0, 640.0

    # Stand-ins for the transformer outputs (T, N, E).
    h_kp = jax.random.normal(k_kp, (T, N, E), jnp.float32)
    h_f = jax.random.normal(k_f, (T, N, E), jnp.float32)

    # PyTorch-convention params for the two heads.
    params_kp = init_mlp_params(k_pkp, E, E, 2, 3)    # linear_class_kp: MLP(256, 256,   2, 3)
    params_f = init_mlp_params(k_pf, E, E, 256, 3)    # linear_class_f:  MLP(256, 256, 256, 3)

    kp_ref, desc_ref = detr4kpnf_head_reference(h_kp, h_f, params_kp, params_f,
                                                my_height, my_width)

    # --- Run A: f32 compute path, tight check against the fp32 PyTorch-formula reference. ---
    prep_f32 = prepare_head_params(params_kp, params_f, compute_dtype=jnp.float32)
    kp_a, desc_a = detr4kpnf_head_forward(h_kp, h_f, prep_f32, my_height, my_width)
    kp_a, desc_a = jax.block_until_ready((kp_a, desc_a))
    assert kp_a.shape == (N, T, 2) and desc_a.shape == (N, T, 256), (kp_a.shape, desc_a.shape)
    assert jnp.allclose(desc_a, desc_ref, atol=5e-4, rtol=5e-4), "desc (f32) mismatch vs reference"
    # round() can turn a ~1e-6 accumulation-order difference into a +/-1 pixel step when
    # kp*width lands exactly on a .5 boundary; allow at most that single step.
    assert jnp.all(jnp.abs(kp_a - kp_ref) <= 1.0), "kp (f32) mismatch vs reference"

    # --- Run B: default bf16 MXU path (the perf configuration).  Checked against a reference
    # built from the SAME prepared bf16 weights, so the only deltas are MXU accumulation order
    # and the Newton-refined reciprocal; also loosely cross-checked against the fp32 math. ---
    prep_bf16 = prepare_head_params(params_kp, params_f)          # compute_dtype=bf16 default
    kp_b, desc_b = detr4kpnf_head_forward(h_kp, h_f, prep_bf16, my_height, my_width)
    kp_b, desc_b = jax.block_until_ready((kp_b, desc_b))
    kp_refb, desc_refb = detr4kpnf_head_reference_prep(h_kp, h_f, prep_bf16,
                                                       my_height, my_width)
    assert kp_b.shape == (N, T, 2) and desc_b.shape == (N, T, 256), (kp_b.shape, desc_b.shape)
    assert jnp.allclose(desc_b, desc_refb, atol=1e-3, rtol=1e-3), "desc (bf16) mismatch vs prep ref"
    assert jnp.all(jnp.abs(kp_b - kp_refb) <= 1.0), "kp (bf16) mismatch vs prep reference"
    # bf16 MXU inputs vs fp32 math: descriptors agree loosely (documented precision choice).
    assert jnp.allclose(desc_b, desc_ref, atol=3e-2, rtol=3e-2), "desc (bf16) drifted vs fp32 ref"

    print("KERNEL_OK")
</pallas_src>

<mosaic_0001>
module attributes {stable_mosaic.version = 11 : i64} {
  func.func @_fused_heads_kernel(%arg0: i32, %arg1: i32, %arg2: memref<1x16x256xf32, #tpu.memory_space<vmem>>, %arg3: memref<1x256x256xf32, #tpu.memory_space<vmem>>, %arg4: memref<1x1x256xf32, #tpu.memory_space<vmem>>, %arg5: memref<1x256x256xf32, #tpu.memory_space<vmem>>, %arg6: memref<1x1x256xf32, #tpu.memory_space<vmem>>, %arg7: memref<1x256x256xf32, #tpu.memory_space<vmem>>, %arg8: memref<1x1x256xf32, #tpu.memory_space<vmem>>, %arg9: memref<1x2x256xf32, #tpu.memory_space<vmem>>, %arg10: memref<1x16x256xf32, #tpu.memory_space<vmem>>) attributes {dimension_semantics = [#tpu.dimension_semantics<parallel>, #tpu.dimension_semantics<parallel>], iteration_bounds = array<i64: 2, 1>, scalar_prefetch = 0 : i64, scratch_operands = 0 : i64, tpu.core_type = #tpu.core_type<tc>, window_params = [{transform_indices = @transform_0, window_bounds = array<i64: 1, 16, 256>}, {transform_indices = @transform_1, window_bounds = array<i64: 1, 256, 256>}, {transform_indices = @transform_2, window_bounds = array<i64: 1, 1, 256>}, {transform_indices = @transform_3, window_bounds = array<i64: 1, 256, 256>}, {transform_indices = @transform_4, window_bounds = array<i64: 1, 1, 256>}, {transform_indices = @transform_5, window_bounds = array<i64: 1, 256, 256>}, {transform_indices = @transform_6, window_bounds = array<i64: 1, 1, 256>}, {transform_indices = @transform_7, window_bounds = array<i64: 1, 2, 256>}, {transform_indices = @transform_8, window_bounds = array<i64: 1, 16, 256>}]} {
    %c0 = arith.constant 0 : index
    %c0_0 = arith.constant 0 : index
    %c0_1 = arith.constant 0 : index
    %0 = vector.load %arg2[%c0, %c0_0, %c0_1] : memref<1x16x256xf32, #tpu.memory_space<vmem>>, vector<1x16x256xf32>
    %1 = vector.shape_cast %0 : vector<1x16x256xf32> to vector<16x256xf32>
    %c0_2 = arith.constant 0 : index
    %c0_3 = arith.constant 0 : index
    %c0_4 = arith.constant 0 : index
    %2 = vector.load %arg3[%c0_2, %c0_3, %c0_4] : memref<1x256x256xf32, #tpu.memory_space<vmem>>, vector<1x256x256xf32>
    %3 = vector.shape_cast %2 : vector<1x256x256xf32> to vector<256x256xf32>
    %cst = arith.constant dense<0.000000e+00> : vector<16x256xf32>
    %4 = tpu.matmul %1, %3, %cst {dimension_numbers = #tpu.dot_dimension_numbers<[1], [0], [0], [1], [0, 0, 1, 1], [], []>} : vector<16x256xf32>, vector<256x256xf32>, vector<16x256xf32> -> vector<16x256xf32>
    %c0_5 = arith.constant 0 : index
    %c0_6 = arith.constant 0 : index
    %c0_7 = arith.constant 0 : index
    %5 = vector.load %arg4[%c0_5, %c0_6, %c0_7] : memref<1x1x256xf32, #tpu.memory_space<vmem>>, vector<1x1x256xf32>
    %6 = vector.shape_cast %5 : vector<1x1x256xf32> to vector<1x256xf32>
    %7 = vector.broadcast %6 : vector<1x256xf32> to vector<16x256xf32>
    %8 = arith.addf %4, %7 : vector<16x256xf32>
    %cst_8 = arith.constant 0.000000e+00 : f32
    %9 = vector.broadcast %cst_8 : f32 to vector<16x256xf32>
    %10 = arith.maximumf %8, %9 : vector<16x256xf32>
    %c0_9 = arith.constant 0 : index
    %c0_10 = arith.constant 0 : index
    %c0_11 = arith.constant 0 : index
    %11 = vector.load %arg5[%c0_9, %c0_10, %c0_11] : memref<1x256x256xf32, #tpu.memory_space<vmem>>, vector<1x256x256xf32>
    %12 = vector.shape_cast %11 : vector<1x256x256xf32> to vector<256x256xf32>
    %cst_12 = arith.constant dense<0.000000e+00> : vector<16x256xf32>
    %13 = tpu.matmul %10, %12, %cst_12 {dimension_numbers = #tpu.dot_dimension_numbers<[1], [0], [0], [1], [0, 0, 1, 1], [], []>} : vector<16x256xf32>, vector<256x256xf32>, vector<16x256xf32> -> vector<16x256xf32>
    %c0_13 = arith.constant 0 : index
    %c0_14 = arith.constant 0 : index
    %c0_15 = arith.constant 0 : index
    %14 = vector.load %arg6[%c0_13, %c0_14, %c0_15] : memref<1x1x256xf32, #tpu.memory_space<vmem>>, vector<1x1x256xf32>
    %15 = vector.shape_cast %14 : vector<1x1x256xf32> to vector<1x256xf32>
    %16 = vector.broadcast %15 : vector<1x256xf32> to vector<16x256xf32>
    %17 = arith.addf %13, %16 : vector<16x256xf32>
    %cst_16 = arith.constant 0.000000e+00 : f32
    %18 = vector.broadcast %cst_16 : f32 to vector<16x256xf32>
    %19 = arith.maximumf %17, %18 : vector<16x256xf32>
    %c0_17 = arith.constant 0 : index
    %c0_18 = arith.constant 0 : index
    %c0_19 = arith.constant 0 : index
    %20 = vector.load %arg7[%c0_17, %c0_18, %c0_19] : memref<1x256x256xf32, #tpu.memory_space<vmem>>, vector<1x256x256xf32>
    %21 = vector.shape_cast %20 : vector<1x256x256xf32> to vector<256x256xf32>
    %cst_20 = arith.constant dense<0.000000e+00> : vector<16x256xf32>
    %22 = tpu.matmul %19, %21, %cst_20 {dimension_numbers = #tpu.dot_dimension_numbers<[1], [0], [0], [1], [0, 0, 1, 1], [], []>} : vector<16x256xf32>, vector<256x256xf32>, vector<16x256xf32> -> vector<16x256xf32>
    %c0_21 = arith.constant 0 : index
    %c0_22 = arith.constant 0 : index
    %c0_23 = arith.constant 0 : index
    %23 = vector.load %arg8[%c0_21, %c0_22, %c0_23] : memref<1x1x256xf32, #tpu.memory_space<vmem>>, vector<1x1x256xf32>
    %24 = vector.shape_cast %23 : vector<1x1x256xf32> to vector<1x256xf32>
    %25 = vector.broadcast %24 : vector<1x256xf32> to vector<16x256xf32>
    %26 = arith.addf %22, %25 : vector<16x256xf32>
    %cst_24 = arith.constant -3.000000e+01 : f32
    %cst_25 = arith.constant 3.000000e+01 : f32
    %27 = vector.broadcast %cst_24 : f32 to vector<16x256xf32>
    %28 = arith.maximumf %27, %26 : vector<16x256xf32>
    %29 = vector.broadcast %cst_25 : f32 to vector<16x256xf32>
    %30 = arith.minimumf %29, %28 : vector<16x256xf32>
    %cst_26 = arith.constant 0.000000e+00 : f32
    %31 = vector.broadcast %cst_26 : f32 to vector<16x256xf32>
    %32 = arith.subf %31, %30 : vector<16x256xf32>
    %33 = math.exp %32 : vector<16x256xf32>
    %cst_27 = arith.constant 1.000000e+00 : f32
    %34 = vector.broadcast %cst_27 : f32 to vector<16x256xf32>
    %35 = arith.addf %34, %33 : vector<16x256xf32>
    %36 = tpu.reciprocal %35 {approx = true} : vector<16x256xf32> -> vector<16x256xf32>
    %37 = arith.mulf %35, %36 : vector<16x256xf32>
    %cst_28 = arith.constant 2.000000e+00 : f32
    %38 = vector.broadcast %cst_28 : f32 to vector<16x256xf32>
    %39 = arith.subf %38, %37 : vector<16x256xf32>
    %40 = arith.mulf %36, %39 : vector<16x256xf32>
    %c0_29 = arith.constant 0 : index
    %c0_30 = arith.constant 0 : index
    %c0_31 = arith.constant 0 : index
    %41 = vector.load %arg9[%c0_29, %c0_30, %c0_31] : memref<1x2x256xf32, #tpu.memory_space<vmem>>, vector<1x2x256xf32>
    %42 = vector.shape_cast %41 : vector<1x2x256xf32> to vector<2x256xf32>
    %43 = vector.extract_strided_slice %42 {offsets = [0, 0], sizes = [1, 256], strides = [1, 1]} : vector<2x256xf32> to vector<1x256xf32>
    %44 = vector.extract_strided_slice %42 {offsets = [1, 0], sizes = [1, 256], strides = [1, 1]} : vector<2x256xf32> to vector<1x256xf32>
    %45 = vector.broadcast %43 : vector<1x256xf32> to vector<16x256xf32>
    %46 = arith.mulf %40, %45 : vector<16x256xf32>
    %47 = math.roundeven %46 : vector<16x256xf32>
    %48 = vector.broadcast %44 : vector<1x256xf32> to vector<16x256xf32>
    %49 = arith.mulf %48, %47 : vector<16x256xf32>
    %cst_32 = arith.constant 1.000000e+00 : f32
    %50 = vector.broadcast %cst_32 : f32 to vector<1x256xf32>
    %51 = arith.subf %50, %44 : vector<1x256xf32>
    %52 = vector.broadcast %51 : vector<1x256xf32> to vector<16x256xf32>
    %53 = arith.mulf %52, %40 : vector<16x256xf32>
    %54 = arith.addf %49, %53 : vector<16x256xf32>
    %c0_33 = arith.constant 0 : index
    %c0_34 = arith.constant 0 : index
    %c0_35 = arith.constant 0 : index
    %55 = vector.load %arg10[%c0_33, %c0_34, %c0_35] : memref<1x16x256xf32, #tpu.memory_space<vmem>>, vector<1x16x256xf32>
    %56 = vector.shape_cast %55 : vector<1x16x256xf32> to vector<16x256xf32>
    %57 = vector.shape_cast %54 : vector<16x256xf32> to vector<1x16x256xf32>
    tpu.vector_store %arg10[%c0_33, %c0_34, %c0_35], %57 {strides = array<i32>} : memref<1x16x256xf32, #tpu.memory_space<vmem>>, vector<1x16x256xf32>,
    return
  }
  func.func @transform_0(%arg0: i32, %arg1: i32) -> (i32, i32, i32) {
    %c0_i32 = arith.constant 0 : i32
    %c0_i32_0 = arith.constant 0 : i32
    return %arg0, %arg1, %c0_i32 : i32, i32, i32
  }
  func.func @transform_1(%arg0: i32, %arg1: i32) -> (i32, i32, i32) {
    %c0_i32 = arith.constant 0 : i32
    %c0_i32_0 = arith.constant 0 : i32
    %c0_i32_1 = arith.constant 0 : i32
    return %arg0, %c0_i32, %c0_i32_0 : i32, i32, i32
  }
  func.func @transform_2(%arg0: i32, %arg1: i32) -> (i32, i32, i32) {
    %c0_i32 = arith.constant 0 : i32
    %c0_i32_0 = arith.constant 0 : i32
    %c0_i32_1 = arith.constant 0 : i32
    return %arg0, %c0_i32, %c0_i32_0 : i32, i32, i32
  }
  func.func @transform_3(%arg0: i32, %arg1: i32) -> (i32, i32, i32) {
    %c0_i32 = arith.constant 0 : i32
    %c0_i32_0 = arith.constant 0 : i32
    %c0_i32_1 = arith.constant 0 : i32
    return %arg0, %c0_i32, %c0_i32_0 : i32, i32, i32
  }
  func.func @transform_4(%arg0: i32, %arg1: i32) -> (i32, i32, i32) {
    %c0_i32 = arith.constant 0 : i32
    %c0_i32_0 = arith.constant 0 : i32
    %c0_i32_1 = arith.constant 0 : i32
    return %arg0, %c0_i32, %c0_i32_0 : i32, i32, i32
  }
  func.func @transform_5(%arg0: i32, %arg1: i32) -> (i32, i32, i32) {
    %c0_i32 = arith.constant 0 : i32
    %c0_i32_0 = arith.constant 0 : i32
    %c0_i32_1 = arith.constant 0 : i32
    return %arg0, %c0_i32, %c0_i32_0 : i32, i32, i32
  }
  func.func @transform_6(%arg0: i32, %arg1: i32) -> (i32, i32, i32) {
    %c0_i32 = arith.constant 0 : i32
    %c0_i32_0 = arith.constant 0 : i32
    %c0_i32_1 = arith.constant 0 : i32
    return %arg0, %c0_i32, %c0_i32_0 : i32, i32, i32
  }
  func.func @transform_7(%arg0: i32, %arg1: i32) -> (i32, i32, i32) {
    %c0_i32 = arith.constant 0 : i32
    %c0_i32_0 = arith.constant 0 : i32
    %c0_i32_1 = arith.constant 0 : i32
    return %arg0, %c0_i32, %c0_i32_0 : i32, i32, i32
  }
  func.func @transform_8(%arg0: i32, %arg1: i32) -> (i32, i32, i32) {
    %c0_i32 = arith.constant 0 : i32
    %c0_i32_0 = arith.constant 0 : i32
    return %arg0, %arg1, %c0_i32 : i32, i32, i32
  }
}

</mosaic_0001>

<bundles_post_ra>
// kernel: tpu_custom_call.1
= control target key start
LH: loop header
LB: loop body
LE: loop exit
PB: predicated region body
PF: predicated region fallthrough
CT: control target
= control target key end

     0   :  { %s2747_s0 = inlined_call_operand.hbm [shape: f32[2,16,256], index: 0, kind: input, shape index: {}]   ;;  %s2748_s1 = inlined_call_operand.hbm [shape: f32[2,256,256], index: 1, kind: input, shape index: {}]   ;;  %s2749_s2 = inlined_call_operand.vmem [shape: f32[2,1,256], index: 2, kind: input, shape index: {}]   ;;  %s2750_s3 = inlined_call_operand.hbm [shape: f32[2,256,256], index: 3, kind: input, shape index: {}]   ;;  %s2751_s4 = inlined_call_operand.hbm [shape: f32[2,1,256], index: 4, kind: input, shape index: {}]   ;;  %s2752_s5 = inlined_call_operand.hbm [shape: f32[2,256,256], index: 5, kind: input, shape index: {}]   ;;  %s2753_s6 = inlined_call_operand.vmem [shape: f32[2,1,256], index: 6, kind: input, shape index: {}]   ;;  %s2754_s7 = inlined_call_operand.vmem [shape: f32[2,2,256], index: 7, kind: input, shape index: {}]   ;;  %s2755_s8 = inlined_call_operand.hbm [shape: f32[2,16,256], index: 8, kind: output, shape index: {}]  }
   0x1   :  { %2774 = sst [smem:[#allocation23_spill]] %s2748_s1 }
   0x2   :  { %2775 = sst [smem:[#allocation24_spill]] %s2755_s8 }
   0x3   :  { %13 = vsyncpa [#allocation3], 0 }
   0x4   :  { %15 = vsyncpa [#allocation3 + $0x1], 0 }
   0x5   :  { %16 = vsyncpa [#allocation6], 0 }
   0x6   :  { %18 = vsyncpa [#allocation6 + $0x1], 0 }
   0x7   :  { %19 = vsyncpa [#allocation9], 0 }
   0x8   :  { %21 = vsyncpa [#allocation9 + $0x1], 0 }
   0x9   :  { %22 = vsyncpa [#allocation4], 0 }
   0xa   :  { %24 = vsyncpa [#allocation4 + $0x1], 0  ;;  %s2043_s27 = smov 0   ;;  %s2045_s28 = smov 0  }
   0xb   :  { %s2047_s29 = smov 0   ;;  %s2049_s30 = smov 0  }
   0xc   :  { %s2051_s9 = smov 0   ;;  %s2053_s10 = smov 0  }
   0xd LB: > { %2776 = sst [smem:[#allocation16_spill]] %s1966_s27  ;;  %s2074_s11 = sadd.s32 4294967295, %s1986_s10   ;;  %s1986_s10 = sphi %s2053_s10, %s30_s10   ;;  %s1982_s9 = sphi %s2051_s9, %s2811_s9   ;;  %s1978_s30 = sphi %s2049_s30, %s2810_s30   ;;  %s1974_s29 = sphi %s2047_s29, %s2806_s29   ;;  %s1970_s28 = sphi %s2045_s28, %s2809_s28   ;;  %s1966_s27 = sphi %s2043_s27, %s2808_s27  }
   0xe   : > { %2777 = sst [smem:[#allocation17_spill]] %s1974_s29  ;;  %s1371_s12 = sadd.s32 4294967294, %s1986_s10  }
   0xf   : > { %2778 = sst [smem:[#allocation18_spill]] %s1986_s10  ;;  %s42_s13 = sadd.s32 1, %s1982_s9 }
  0x10   : > { %s51_s14 = sadd.s32 1, %s1974_s29  ;;  %p44_p0 = scmp.ge.s32.totalorder %s42_s13, 2 }
  0x11   : > { %p58_p1 = scmp.ne.s32.totalorder %s1974_s29, %s1970_s28  ;;  %p59_p2 = scmp.eq.s32.totalorder %s1986_s10, 0 }
  0x12   : > { %p64_p3 = scmp.ne.s32.totalorder %s1970_s28, %s1966_s27  ;;  %s2813_s13 = smov (%p44_p0, %s42_s13), 0 }
  0x13   : > { %2779 = sst [smem:[#allocation19_spill]] %s2813_s13  ;;  %p2086_p4 = por %p59_p2, %p58_p1 }
  0x14   : > { %p65_p5 = scmp.eq.s32.totalorder %s2074_s11, 0  ;;  %s46_s16 = ssub.s32 %s1982_s9, %s2813_s13 }
  0x15   : > { %p272_p6 = scmp.eq.s32.totalorder %s2074_s11, 1  ;;  %p49_p7 = scmp.eq.s32.totalorder %s46_s16, 0 }
  0x16   : > { %p2094_p8 = por %p65_p5, %p64_p3  ;;  %p278_p10 = scmp.eq.s32.totalorder %s1371_s12, 1 }
  0x17   : > { %p2098_p9 = por %p272_p6, %p58_p1  ;;  %p1676_p13 = scmp.lt.s32.totalorder %s1986_s10, 2 }
  0x18   : > { %s2781_s17 = scalar_select %p2094_p8, 1, 0 }
  0x19   : > { %s2782_s18 = scalar_select %p2098_p9, 1, 0 }
  0x1a   : > { %s2103_s19 = scalar_select %p49_p7, %s1974_s29, %s51_s14  }
  0x1b   : > { %2783 = sst [smem:[#allocation20_spill]] %s2782_s18  ;;  %p2105_p11 = por %p278_p10, %p64_p3 }
  0x1c   : > { %2784 = sst [smem:[#allocation21_spill]] %s2103_s19  ;;  %s2112_s21 = sand.u32 1, %s1974_s29  }
  0x1d   : > { %s2785_s20 = scalar_select %p2105_p11, 1, 0 }
  0x1e   : > { %p2116_p0 = pnand %p1676_p13, %p2086_p4  ;;  %s2760_s23 = sand.u32 1, %s1986_s10  }
  0x1f   : > { %2786 = sst [smem:[#allocation22_spill]] %s2785_s20  ;;  %s2122_s24 = sshll.u32 %s2112_s21, 9 }
  0x20   : > { %s2787_s22 = scalar_select %p2116_p0, 1, 0 }
  0x21   : > { %s2125_s25 = sshll.u32 %s1982_s9, 13  ;;  %s326_s26 = scalar_lea.vmem [#allocation5], %s2122_s24 }
  0x22   : > { %s333_s12 = sshll.u32 %s326_s26, 4  ;;  %s2788_s1 = sld [smem:[#allocation23_spill]]  ;;  %s2134_s12 = int_to_ptr.vmem [resolvable:$true] %s333_s12 }
  0x23   : > { %s2138_s15 = scalar_lea.sflag [#allocation6], %s2760_s23  ;;  %p2144_p2 = pneg %p2116_p0 }
  0x28   : > { %s2132_s13 = scalar_lea.hbm %s2788_s1, %s2125_s25  ;;  %s1751_s16 = scalar_lea.hbm %s2788_s1, 16384 }
  0x29   : > { %s1746_s19 = scalar_lea.hbm %s2132_s13, 8192  ;;  %p1752_p5 = scmp.lt.u32.totalorder %s2132_s13, %s2788_s1 }
  0x2a   : > { %p1747_p1 = scmp.ne.s32.totalorder %s2132_s13, %s1746_s19  ;;  %p1753_p6 = scmp.lt.u32.totalorder %s1751_s16, %s1746_s19 }
  0x2b   : > { %p1755_p10 = scmp.lt.u32.totalorder %s1746_s19, %s2132_s13 }
  0x2c   : > { %p1749_p3 = pnand %p2144_p2, %p1747_p1  ;;  %p1754_p7 = por %p1753_p6, %p1752_p5 }
  0x2e   : > { %p1750_p4 = pneg %p1749_p3  ;;  %p1756_p13 = por %p1755_p10, %p1754_p7 }
  0x30   : > { %p1757_p12 = pnand %p1756_p13, %p1750_p4 }
  0x32   : > { %1760 = shalt.err (!%p1757_p12)
}
  0x33   : > { %s1761_s23 = scalar_lea.vmem %s2134_s12, 8192  ;;  %s1988_s26 = smov [#allocation5]  }
  0x34   : > { %p1762_p1 = scmp.ne.s32.totalorder %s2134_s12, %s1761_s23  ;;  %s1766_s14 = sshll.u32 %s1988_s26, 4  ;;  %s1767_s14 = int_to_ptr.vmem [resolvable:$false] %s1766_s14 }
  0x35   : > { %s1768_s27 = scalar_lea.vmem %s1767_s14, 16384  ;;  %p1769_p9 = scmp.lt.s32.totalorder %s2134_s12, %s1767_s14 }
  0x36   : > { %p1764_p3 = pnand %p1762_p1, %p2144_p2  ;;  %p1770_p8 = scmp.lt.s32.totalorder %s1768_s27, %s1761_s23 }
  0x38   : > { %p1765_p11 = pneg %p1764_p3  ;;  %p1771_p5 = por %p1770_p8, %p1769_p9 }
  0x3a   : > { %p1772_p6 = pnand %p1771_p5, %p1765_p11 }
  0x3c   : > { %1775 = shalt.err (!%p1772_p6)
}
  0x3d   : > { %s2766_s19 = smov 256   ;;  %s2768_s20 = smov 16  }
  0x3e   : > { %1662 = dma.hbm_to_vmem [thread:$0]  (!%p2116_p0), %s2132_s13, 8192, %s2134_s12, %s2138_s15, %s2766_s19, %s2766_s19, %s2768_s20  }
  0x3f   : > { %p1389_p8 = scmp.ge.s32.totalorder %s1986_s10, 1  ;;  %p424_p9 = scmp.lt.s32.totalorder %s1986_s10, 3 }
  0x40   : > { %s1383_s23 = sshll.u32 %s2112_s21, 1  ;;  %s1412_s26 = sshll.u32 %s1982_s9, 5 }
  0x41   : > { %p2174_p11 = pnand %p1389_p8, %p424_p9  ;;  %s375_s14 = scalar_lea.vmem [#allocation8], %s1383_s23 }
  0x42   : > { %s383_s27 = sshll.u32 %s375_s14, 4  ;;  %s2182_s18 = scalar_lea.hbm %s2751_s4, %s1412_s26  ;;  %s384_s27 = int_to_ptr.vmem [resolvable:$true] %s383_s27 }
  0x43   : > { %s2790_s16 = scalar_select %p2174_p11, 1, 0 }
  0x44   : > { %s2791_s13 = sand.u32 1, %s1986_s10   ;;  %s1776_s19 = scalar_lea.hbm %s2182_s18, 32 }
  0x45   : > { %s2186_s12 = scalar_lea.sflag [#allocation9], %s2791_s13  ;;  %p1777_p12 = scmp.ne.s32.totalorder %s2182_s18, %s1776_s19 }
  0x46   : > { %s1781_s20 = scalar_lea.hbm %s2751_s4, 64  ;;  %p1782_p10 = scmp.lt.u32.totalorder %s2182_s18, %s2751_s4 }
  0x47   : > { %p1779_p4 = pnand %p1777_p12, %p2144_p2  ;;  %p1783_p13 = scmp.lt.u32.totalorder %s1781_s20, %s1776_s19 }
  0x48   : > { %p1785_p3 = scmp.lt.u32.totalorder %s1776_s19, %s2182_s18 }
  0x49   : > { %p1780_p7 = pneg %p1779_p4  ;;  %p1784_p1 = por %p1783_p13, %p1782_p10 }
  0x4b   : > { %p1786_p5 = por %p1785_p3, %p1784_p1 }
  0x4d   : > { %p1787_p6 = pnand %p1786_p5, %p1780_p7 }
  0x4f   : > { %1790 = shalt.err (!%p1787_p6)
}
  0x50   : > { %s1791_s26 = scalar_lea.vmem %s384_s27, 32  ;;  %s1991_s13 = smov [#allocation8]  }
  0x51   : > { %p1792_p8 = scmp.ne.s32.totalorder %s384_s27, %s1791_s26  ;;  %s1796_s10 = sshll.u32 %s1991_s13, 4  ;;  %s1797_s10 = int_to_ptr.vmem [resolvable:$false] %s1796_s10 }
  0x52   : > { %s1798_s23 = scalar_lea.vmem %s1797_s10, 64  ;;  %p1799_p4 = scmp.lt.s32.totalorder %s384_s27, %s1797_s10 }
  0x53   : > { %p1794_p9 = pnand %p1792_p8, %p2144_p2  ;;  %p1800_p11 = scmp.lt.s32.totalorder %s1798_s23, %s1791_s26 }
  0x55   : > { %p1795_p12 = pneg %p1794_p9  ;;  %p1801_p0 = por %p1800_p11, %p1799_p4 }
  0x57   : > { %p1802_p10 = pnand %p1801_p0, %p1795_p12 }
  0x59   : > { %1805 = shalt.err (!%p1802_p10)
}
  0x5a   : > { %p2792_p13 = scmp.ne.s32.totalorder %s2787_s22, 0  ;;  %s1374_s19 = sshll.u32 %s2112_s21, 5 }
  0x5b   : > { %s1409_s20 = sshll.u32 %s1982_s9, 9  ;;  %s302_s10 = scalar_lea.vmem [#allocation2], %s1374_s19 }
  0x5c   : > { %1668 = dma.hbm_to_vmem [thread:$0]  (!%p2792_p13), %s2182_s18, 32, %s384_s27, %s2186_s12  }
  0x5d   : > { %s2211_s8 = scalar_lea.hbm %s2747_s0, %s1409_s20  ;;  %s312_s26 = sshll.u32 %s302_s10, 4  ;;  %s2213_s26 = int_to_ptr.vmem [resolvable:$true] %s312_s26 }
  0x5e   : > { %s299_s13 = scalar_lea.sflag [#allocation3], %s2112_s21  ;;  %s1806_s23 = scalar_lea.hbm %s2211_s8, 512 }
  0x5f   : > { %p1807_p0 = scmp.ne.s32.totalorder %s2211_s8, %s1806_s23  ;;  %s1811_s14 = scalar_lea.hbm %s2747_s0, 1024 }
  0x60   : > { %p1812_p1 = scmp.lt.u32.totalorder %s2211_s8, %s2747_s0  ;;  %p1813_p3 = scmp.lt.u32.totalorder %s1811_s14, %s1806_s23 }
  0x61   : > { %p1809_p11 = pnand %p1807_p0, %p2144_p2  ;;  %p1815_p6 = scmp.lt.u32.totalorder %s1806_s23, %s2211_s8 }
  0x62   : > { %p1814_p5 = por %p1813_p3, %p1812_p1 }
  0x63   : > { %p1810_p7 = pneg %p1809_p11 }
  0x64   : > { %p1816_p8 = por %p1815_p6, %p1814_p5 }
  0x66   : > { %p1817_p9 = pnand %p1816_p8, %p1810_p7 }
  0x68   : > { %1820 = shalt.err (!%p1817_p9)
}
  0x69   : > { %s1821_s19 = scalar_lea.vmem %s2213_s26, 512  ;;  %s1992_s10 = smov [#allocation2]  }
  0x6a   : > { %p1822_p12 = scmp.ne.s32.totalorder %s2213_s26, %s1821_s19  ;;  %s1826_s18 = sshll.u32 %s1992_s10, 4  ;;  %s1827_s18 = int_to_ptr.vmem [resolvable:$false] %s1826_s18 }
  0x6b   : > { %s1828_s27 = scalar_lea.vmem %s1827_s18, 1024  ;;  %p1829_p0 = scmp.lt.s32.totalorder %s2213_s26, %s1827_s18 }
  0x6c   : > { %p1824_p4 = pnand %p1822_p12, %p2144_p2  ;;  %p1830_p11 = scmp.lt.s32.totalorder %s1828_s27, %s1821_s19 }
  0x6e   : > { %p1825_p10 = pneg %p1824_p4  ;;  %p1831_p1 = por %p1830_p11, %p1829_p0 }
  0x70   : > { %p1832_p3 = pnand %p1831_p1, %p1825_p10 }
  0x72   : > { %1835 = shalt.err (!%p1832_p3)
}
  0x73   : > { %s2793_s23 = smov 16   ;;  %s2794_s14 = smov 256  }
  0x74   : > { %1659 = dma.hbm_to_vmem [thread:$0]  (!%p2792_p13), %s2211_s8, 512, %s2213_s26, %s299_s13, %s2794_s14, %s2794_s14, %s2793_s23  }
  0x75   : > { %s2246_s19 = scalar_lea.hbm %s2750_s3, %s2125_s25  ;;  %s354_s10 = scalar_lea.vmem [#allocation7], %s2122_s24 }
  0x76   : > { %s361_s18 = sshll.u32 %s354_s10, 4  ;;  %s1836_s21 = scalar_lea.hbm %s2246_s19, 8192  ;;  %s2249_s18 = int_to_ptr.vmem [resolvable:$true] %s361_s18 }
  0x77   : > { %p1837_p7 = scmp.ne.s32.totalorder %s2246_s19, %s1836_s21  ;;  %s1841_s26 = scalar_lea.hbm %s2750_s3, 16384 }
  0x78   : > { %p1842_p8 = scmp.lt.u32.totalorder %s2246_s19, %s2750_s3  ;;  %p1843_p9 = scmp.lt.u32.totalorder %s1841_s26, %s1836_s21 }
  0x79   : > { %p1839_p5 = pnand %p1837_p7, %p2144_p2  ;;  %p1845_p4 = scmp.lt.u32.totalorder %s1836_s21, %s2246_s19 }
  0x7a   : > { %p1844_p12 = por %p1843_p9, %p1842_p8 }
  0x7b   : > { %p1840_p6 = pneg %p1839_p5 }
  0x7c   : > { %p1846_p10 = por %p1845_p4, %p1844_p12 }
  0x7e   : > { %p1847_p0 = pnand %p1846_p10, %p1840_p6 }
  0x80   : > { %1850 = shalt.err (!%p1847_p0)
}
  0x81   : > { %s1851_s1 = scalar_lea.vmem %s2249_s18, 8192  ;;  %s1993_s10 = smov [#allocation7]  }
  0x82   : > { %p1852_p11 = scmp.ne.s32.totalorder %s2249_s18, %s1851_s1  ;;  %s1856_s27 = sshll.u32 %s1993_s10, 4  ;;  %s1857_s27 = int_to_ptr.vmem [resolvable:$false] %s1856_s27 }
  0x83   : > { %s1858_s8 = scalar_lea.vmem %s1857_s27, 16384  ;;  %p1859_p7 = scmp.lt.s32.totalorder %s2249_s18, %s1857_s27 }
  0x84   : > { %p1854_p1 = pnand %p1852_p11, %p2144_p2  ;;  %p1860_p5 = scmp.lt.s32.totalorder %s1858_s8, %s1851_s1 }
  0x86   : > { %p1855_p3 = pneg %p1854_p1  ;;  %p1861_p8 = por %p1860_p5, %p1859_p7 }
  0x88   : > { %p1862_p9 = pnand %p1861_p8, %p1855_p3 }
  0x8a   : > { %1865 = shalt.err (!%p1862_p9)
}
  0x8b   : > { %1665 = dma.hbm_to_vmem [thread:$0]  (!%p2792_p13), %s2246_s19, 8192, %s2249_s18, %s2138_s15, %s2794_s14, %s2794_s14, %s2793_s23  }
  0x8c   : > { %s2280_s13 = scalar_lea.hbm %s2752_s5, %s2125_s25  ;;  %s394_s20 = scalar_lea.vmem [#allocation10], %s2122_s24 }
  0x8d   : > { %s401_s1 = sshll.u32 %s394_s20, 4  ;;  %s1866_s10 = scalar_lea.hbm %s2280_s13, 8192  ;;  %s2283_s1 = int_to_ptr.vmem [resolvable:$true] %s401_s1 }
  0x8e   : > { %p1867_p6 = scmp.ne.s32.totalorder %s2280_s13, %s1866_s10  ;;  %s1871_s19 = scalar_lea.hbm %s2752_s5, 16384 }
  0x8f   : > { %p1872_p10 = scmp.lt.u32.totalorder %s2280_s13, %s2752_s5  ;;  %p1873_p0 = scmp.lt.u32.totalorder %s1871_s19, %s1866_s10 }
  0x90   : > { %p1869_p12 = pnand %p1867_p6, %p2144_p2  ;;  %p1875_p1 = scmp.lt.u32.totalorder %s1866_s10, %s2280_s13 }
  0x91   : > { %p1874_p11 = por %p1873_p0, %p1872_p10 }
  0x92   : > { %p1870_p4 = pneg %p1869_p12 }
  0x93   : > { %p1876_p3 = por %p1875_p1, %p1874_p11 }
  0x95   : > { %p1877_p7 = pnand %p1876_p3, %p1870_p4 }
  0x97   : > { %1880 = shalt.err (!%p1877_p7)
}
  0x98   : > { %s1881_s24 = scalar_lea.vmem %s2283_s1, 8192  ;;  %s1994_s8 = smov [#allocation10]  }
  0x99   : > { %p1882_p5 = scmp.ne.s32.totalorder %s2283_s1, %s1881_s24  ;;  %s1886_s21 = sshll.u32 %s1994_s8, 4  ;;  %s1887_s21 = int_to_ptr.vmem [resolvable:$false] %s1886_s21 }
  0x9a   : > { %s1888_s26 = scalar_lea.vmem %s1887_s21, 16384  ;;  %p1889_p6 = scmp.lt.s32.totalorder %s2283_s1, %s1887_s21 }
  0x9b   : > { %p1884_p8 = pnand %p1882_p5, %p2144_p2  ;;  %p1890_p12 = scmp.lt.s32.totalorder %s1888_s26, %s1881_s24 }
  0x9d   : > { %p1885_p9 = pneg %p1884_p8  ;;  %p1891_p10 = por %p1890_p12, %p1889_p6 }
  0x9f   : > { %p1892_p0 = pnand %p1891_p10, %p1885_p9 }
  0xa1   : > { %1895 = shalt.err (!%p1892_p0)
}
  0xa2   : > { %1671 = dma.hbm_to_vmem [thread:$0]  (!%p2792_p13), %s2280_s13, 8192, %s2283_s1, %s2186_s12, %s2794_s14, %s2794_s14, %s2793_s23  }
  0xa3   : > { %p2795_p2 = scmp.ne.s32.totalorder %s2790_s16, 0 }
  0xa4   : > { %s2313_s29 = sand.u32 (!%p2795_p2), 1, %s1970_s28   ;;  %p2796_p4 = scmp.ne.s32.totalorder (!%p2795_p2), %s2781_s17, 0 }
  0xa5   : > { %428 = sbr.rel (%p2795_p2) target bundleno = 960 (0x3c0), region = 52  ;;  %s1390_s20 = sshll.u32 (!%p2795_p2), %s2313_s29, 5 }
  0xa6   : > { %s431_s10 = scalar_lea.sflag (!%p2795_p2), [#allocation3], %s2313_s29  ;;  %s2319_s22 = scalar_lea.vmem (!%p2795_p2), [#allocation2], %s1390_s20 }
  0xac   : > { %1949 = dma.done.wait (%p2796_p4), %s431_s10, 512  }
  0xad   : > { %1951 = vsyncadd (%p2796_p4), %s431_s10, 4294966784  ;;  %s439_s16 = sand.u32 1, %s2074_s11   ;;  %s2327_s12 = sshll.u32 %s2313_s29, 9 }
  0xae   : > { %s440_s23 = scalar_lea.sflag [#allocation6], %s439_s16  ;;  %s2330_s14 = scalar_lea.vmem [#allocation5], %s2327_s12 }
  0xaf   : > { %1953 = dma.done.wait (%p2796_p4), %s440_s23, 16384  }
  0xb0   : > { %1955 = vsyncadd (%p2796_p4), %s440_s23, 4294950912  ;;  %s1393_s13 = sshll.u32 %s2313_s29, 1  ;;  %s2338_s1 = scalar_lea.vmem [#allocation7], %s2327_s12 }
  0xb1   : > { %s458_s27 = scalar_lea.sflag [#allocation9], %s439_s16  ;;  %s2340_s15 = scalar_lea.vmem [#allocation8], %s1393_s13 }
  0xb2   : > { %1957 = dma.done.wait (%p2796_p4), %s458_s27, 8224  }
  0xb3   : > { %1959 = vsyncadd (%p2796_p4), %s458_s27, 4294959072  ;;  %v556_v0 = vld [vmem:[%s2330_s14 + $0x8] sm:$0xff]  ;;  %v558_v1 = vld [vmem:[%s2330_s14 + $0x18] sm:$0xff]  ;;  %s2479_s11 = scalar_lea.vmem [#allocation10], %s2327_s12  ;;  %p537_p13 = scmp.lt.s32.totalorder %s1978_s30, 1 }
  0xb4   : > { %v555_v2 = vld [vmem:[%s2330_s14] sm:$0xff]  ;;  %v1416_v3 = vpack.c.bf16 %v558_v1, %v556_v0  ;;  %v557_v4 = vld [vmem:[%s2330_s14 + $0x10] sm:$0xff]  ;;  %v560_v5 = vld [vmem:[%s2330_s14 + $0x28] sm:$0xff]  ;;  %s1415_s23 = sshll.u32 %s1978_s30, 9  ;;  %s535_s13 = scalar_lea.vmem [#allocation11], %s1390_s20 }
  0xb5   : > { %v562_v6 = vld [vmem:[%s2330_s14 + $0x38] sm:$0xff]  ;;  %v1418_v7 = vpack.c.bf16 %v557_v4, %v555_v2  ;;  %v559_v9 = vld [vmem:[%s2330_s14 + $0x20] sm:$0xff]  ;;  %v561_v10 = vld [vmem:[%s2330_s14 + $0x30] sm:$0xff]  ;;  %s2616_s17 = scalar_select %p537_p13, %s1978_s30, 1 }
  0xb6   : > { %v1420_v8 = vpack.c.bf16 %v562_v6, %v560_v5  ;;  %v564_v11 = vld [vmem:[%s2330_s14 + $0x48] sm:$0xff]  ;;  %1417 = vmatprep.subr.bf16.mxu0 %v1416_v3  ;;  %v566_v12 = vld [vmem:[%s2330_s14 + $0x58] sm:$0xff]  ;;  %v1422_v13 = vpack.c.bf16 %v561_v10, %v559_v9  ;;  %v563_v15 = vld [vmem:[%s2330_s14 + $0x40] sm:$0xff]  ;;  %s1145_s30 = scalar_lea.sflag [#allocation4], %s2313_s29 }
  0xb7   : > { %1419 = vmatpush1.bf16.msra.mxu0 %v1418_v7  ;;  %v1424_v14 = vpack.c.bf16 %v566_v12, %v564_v11  ;;  %v565_v16 = vld [vmem:[%s2330_s14 + $0x50] sm:$0xff]  ;;  %v568_v17 = vld [vmem:[%s2330_s14 + $0x68] sm:$0xff]  ;;  %v570_v18 = vld [vmem:[%s2330_s14 + $0x78] sm:$0xff]  ;;  %s1396_s19 = sshll.u32 %s2616_s17, 1  ;;  %s1414_s10 = sshll.u32 %s2616_s17, 2 }
  0xb8   : > { %1421 = vmatprep.subr.bf16.mxu0 %v1420_v8  ;;  %v1426_v19 = vpack.c.bf16 %v565_v16, %v563_v15  ;;  %v1428_v20 = vpack.c.bf16 %v570_v18, %v568_v17  ;;  %v567_v21 = vld [vmem:[%s2330_s14 + $0x60] sm:$0xff]  ;;  %v569_v22 = vld [vmem:[%s2330_s14 + $0x70] sm:$0xff]  ;;  %v572_v23 = vld [vmem:[%s2330_s14 + $0x88] sm:$0xff]  ;;  %s540_s24 = scalar_lea.vmem %s2749_s2, %s1396_s19  ;;  %s544_s26 = scalar_lea.vmem %s2753_s6, %s1396_s19 }
  0xb9   : > { %v574_v24 = vld [vmem:[%s2330_s14 + $0x98] sm:$0xff]  ;;  %v1430_v25 = vpack.c.bf16 %v569_v22, %v567_v21  ;;  %v571_v27 = vld [vmem:[%s2330_s14 + $0x80] sm:$0xff]  ;;  %v573_v28 = vld [vmem:[%s2330_s14 + $0x90] sm:$0xff]  ;;  %s549_s12 = scalar_lea.vmem %s2754_s7, %s1414_s10  ;;  %s1995_s19 = smov [#allocation11]  }
  0xba   : > { %v1432_v26 = vpack.c.bf16 %v574_v24, %v572_v23  ;;  %v576_v29 = vld [vmem:[%s2330_s14 + $0xa8] sm:$0xff]  ;;  %v578_v30 = vld [vmem:[%s2330_s14 + $0xb8] sm:$0xff]  ;;  %v1434_v31 = vpack.c.bf16 %v573_v28, %v571_v27  ;;  %v575_v33 = vld [vmem:[%s2330_s14 + $0xa0] sm:$0xff]  ;;  %s1900_s18 = sshll.u32 %s1995_s19, 4  ;;  %s1901_s18 = int_to_ptr.vmem [resolvable:$false] %s1900_s18 }
  0xbb   : > { %1423 = vmatpush1.bf16.msra.mxu0 %v1422_v13  ;;  %v1436_v32 = vpack.c.bf16 %v578_v30, %v576_v29  ;;  %v577_v34 = vld [vmem:[%s2330_s14 + $0xb0] sm:$0xff]  ;;  %v580_v35 = vld [vmem:[%s2330_s14 + $0xc8] sm:$0xff]  ;;  %v582_v36 = vld [vmem:[%s2330_s14 + $0xd8] sm:$0xff]  ;;  %s1902_s25 = scalar_lea.vmem %s1901_s18, 1024 }
  0xbc   : > { %1425 = vmatprep.subr.bf16.mxu0 %v1424_v14  ;;  %v1438_v37 = vpack.c.bf16 %v577_v34, %v575_v33  ;;  %v1440_v38 = vpack.c.bf16 %v582_v36, %v580_v35  ;;  %v579_v39 = vld [vmem:[%s2330_s14 + $0xc0] sm:$0xff]  ;;  %v581_v40 = vld [vmem:[%s2330_s14 + $0xd0] sm:$0xff]  ;;  %v552_v41 = vld [vmem:[%s2319_s22 + $0x8] sm:$0xff] }
  0xbd   : > { %v584_v42 = vld [vmem:[%s2330_s14 + $0xe8] sm:$0xff]  ;;  %v586_v43 = vld [vmem:[%s2330_s14 + $0xf8] sm:$0xff]  ;;  %695 = vmatprep.mubr.f32.mxu0 %v552_v41  ;;  %v583_v45 = vld [vmem:[%s2330_s14 + $0xe0] sm:$0xff]  ;;  %v1442_v50 = vpack.c.bf16 %v581_v40, %v579_v39 }
  0xbe   : > { %v713_v44 = vld [vmem:[%s2338_s1 + $0x8] sm:$0xff]  ;;  %v585_v46 = vld [vmem:[%s2330_s14 + $0xf0] sm:$0xff]  ;;  %v715_v47 = vld [vmem:[%s2338_s1 + $0x18] sm:$0xff]  ;;  %v1444_v56 = vpack.c.bf16 %v586_v43, %v584_v42 }
  0xbf   : > { %1427 = vmatpush1.bf16.msra.mxu0 %v1426_v19  ;;  %v712_v48 = vld [vmem:[%s2338_s1] sm:$0xff]  ;;  %v714_v49 = vld [vmem:[%s2338_s1 + $0x10] sm:$0xff]  ;;  %v1480_v51 = vpack.c.bf16 %v715_v47, %v713_v44  ;;  %v717_v53 = vld [vmem:[%s2338_s1 + $0x28] sm:$0xff]  ;;  %v1446_v0 = vpack.c.bf16 %v585_v46, %v583_v45 }
  0xc0   : > { %1429 = vmatprep.subr.bf16.mxu0 %v1428_v20  ;;  %v1482_v52 = vpack.c.bf16 %v714_v49, %v712_v48  ;;  %v719_v54 = vld [vmem:[%s2338_s1 + $0x38] sm:$0xff]  ;;  %v716_v55 = vld [vmem:[%s2338_s1 + $0x20] sm:$0xff]  ;;  %v718_v58 = vld [vmem:[%s2338_s1 + $0x30] sm:$0xff] }
  0xc1   : > { %v1484_v57 = vpack.c.bf16 %v719_v54, %v717_v53  ;;  %v721_v59 = vld [vmem:[%s2338_s1 + $0x48] sm:$0xff]  ;;  %v723_v60 = vld [vmem:[%s2338_s1 + $0x58] sm:$0xff]  ;;  %1481 = vmatprep.subr.bf16.mxu1 %v1480_v51  ;;  %v1486_v63 = vpack.c.bf16 %v718_v58, %v716_v55  ;;  %v587_v1 = vld [vmem:[%s2330_s14 + $0x100] sm:$0xff] }
  0xc2   : > { %v588_v61 = vld [vmem:[%s2330_s14 + $0x108] sm:$0xff]  ;;  %v590_v62 = vld [vmem:[%s2330_s14 + $0x118] sm:$0xff]  ;;  %1483 = vmatpush1.bf16.msra.mxu1 %v1482_v52  ;;  %v1488_v2 = vpack.c.bf16 %v723_v60, %v721_v59  ;;  %v720_v3 = vld [vmem:[%s2338_s1 + $0x40] sm:$0xff] }
  0xc3   : > { %1431 = vmatpush1.bf16.msra.mxu0 %v1430_v25  ;;  %1485 = vmatprep.subr.bf16.mxu1 %v1484_v57  ;;  %v722_v4 = vld [vmem:[%s2338_s1 + $0x50] sm:$0xff]  ;;  %v1448_v5 = vpack.c.bf16 %v590_v62, %v588_v61  ;;  %v725_v7 = vld [vmem:[%s2338_s1 + $0x68] sm:$0xff]  ;;  %v727_v8 = vld [vmem:[%s2338_s1 + $0x78] sm:$0xff] }
  0xc4   : > { %1433 = vmatprep.subr.bf16.mxu0 %v1432_v26  ;;  %v589_v6 = vld [vmem:[%s2330_s14 + $0x110] sm:$0xff]  ;;  %v592_v9 = vld [vmem:[%s2330_s14 + $0x128] sm:$0xff]  ;;  %v594_v10 = vld [vmem:[%s2330_s14 + $0x138] sm:$0xff]  ;;  %v1490_v11 = vpack.c.bf16 %v722_v4, %v720_v3  ;;  %v1492_v14 = vpack.c.bf16 %v727_v8, %v725_v7 }
  0xc5   : > { %v1450_v12 = vpack.c.bf16 %v589_v6, %v587_v1  ;;  %v591_v13 = vld [vmem:[%s2330_s14 + $0x120] sm:$0xff]  ;;  %v726_v16 = vld [vmem:[%s2338_s1 + $0x70] sm:$0xff]  ;;  %v1452_v17 = vpack.c.bf16 %v594_v10, %v592_v9  ;;  %v729_v19 = vld [vmem:[%s2338_s1 + $0x88] sm:$0xff] }
  0xc6   : > { %1487 = vmatpush1.bf16.msra.mxu1 %v1486_v63  ;;  %v724_v15 = vld [vmem:[%s2338_s1 + $0x60] sm:$0xff]  ;;  %v593_v18 = vld [vmem:[%s2330_s14 + $0x130] sm:$0xff]  ;;  %v731_v20 = vld [vmem:[%s2338_s1 + $0x98] sm:$0xff] }
  0xc7   : > { %1435 = vmatpush1.bf16.msra.mxu0 %v1434_v31  ;;  %1489 = vmatprep.subr.bf16.mxu1 %v1488_v2  ;;  %v596_v21 = vld [vmem:[%s2330_s14 + $0x148] sm:$0xff]  ;;  %v598_v22 = vld [vmem:[%s2330_s14 + $0x158] sm:$0xff]  ;;  %v1494_v23 = vpack.c.bf16 %v726_v16, %v724_v15  ;;  %v1454_v24 = vpack.c.bf16 %v593_v18, %v591_v13  ;;  %v595_v25 = vld [vmem:[%s2330_s14 + $0x140] sm:$0xff]  ;;  %v1496_v26 = vpack.c.bf16 %v731_v20, %v729_v19 }
  0xc8   : > { %1437 = vmatprep.subr.bf16.mxu0 %v1436_v32  ;;  %v728_v27 = vld [vmem:[%s2338_s1 + $0x80] sm:$0xff]  ;;  %v730_v28 = vld [vmem:[%s2338_s1 + $0x90] sm:$0xff]  ;;  %v1456_v29 = vpack.c.bf16 %v598_v22, %v596_v21  ;;  %v733_v31 = vld [vmem:[%s2338_s1 + $0xa8] sm:$0xff] }
  0xc9   : > { %v597_v30 = vld [vmem:[%s2330_s14 + $0x150] sm:$0xff]  ;;  %v735_v32 = vld [vmem:[%s2338_s1 + $0xb8] sm:$0xff]  ;;  %v600_v33 = vld [vmem:[%s2330_s14 + $0x168] sm:$0xff]  ;;  %v1498_v35 = vpack.c.bf16 %v730_v28, %v728_v27 }
  0xca   : > { %1491 = vmatpush1.bf16.msra.mxu1 %v1490_v11  ;;  %v602_v34 = vld [vmem:[%s2330_s14 + $0x178] sm:$0xff]  ;;  %v1458_v36 = vpack.c.bf16 %v597_v30, %v595_v25  ;;  %v732_v39 = vld [vmem:[%s2338_s1 + $0xa0] sm:$0xff]  ;;  %v734_v40 = vld [vmem:[%s2338_s1 + $0xb0] sm:$0xff] }
  0xcb   : > { %1439 = vmatpush1.bf16.msra.mxu0 %v1438_v37  ;;  %1493 = vmatprep.subr.bf16.mxu1 %v1492_v14  ;;  %v599_v37 = vld [vmem:[%s2330_s14 + $0x160] sm:$0xff]  ;;  %v1460_v41 = vpack.c.bf16 %v602_v34, %v600_v33  ;;  %v601_v42 = vld [vmem:[%s2330_s14 + $0x170] sm:$0xff]  ;;  %v737_v43 = vld [vmem:[%s2338_s1 + $0xc8] sm:$0xff]  ;;  %v1502_v47 = vpack.c.bf16 %v734_v40, %v732_v39 }
  0xcc   : > { %1441 = vmatprep.subr.bf16.mxu0 %v1440_v38  ;;  %v1500_v38 = vpack.c.bf16 %v735_v32, %v733_v31  ;;  %v739_v44 = vld [vmem:[%s2338_s1 + $0xd8] sm:$0xff]  ;;  %v604_v45 = vld [vmem:[%s2330_s14 + $0x188] sm:$0xff]  ;;  %v1462_v48 = vpack.c.bf16 %v601_v42, %v599_v37  ;;  %v603_v49 = vld [vmem:[%s2330_s14 + $0x180] sm:$0xff] }
  0xcd   : > { %v606_v46 = vld [vmem:[%s2330_s14 + $0x198] sm:$0xff]  ;;  %v736_v51 = vld [vmem:[%s2338_s1 + $0xc0] sm:$0xff]  ;;  %v738_v52 = vld [vmem:[%s2338_s1 + $0xd0] sm:$0xff] }
  0xce   : > { %1495 = vmatpush1.bf16.msra.mxu1 %v1494_v23  ;;  %v1464_v53 = vpack.c.bf16 %v606_v46, %v604_v45  ;;  %v605_v54 = vld [vmem:[%s2330_s14 + $0x190] sm:$0xff]  ;;  %v741_v55 = vld [vmem:[%s2338_s1 + $0xe8] sm:$0xff]  ;;  %v610_v58 = vld [vmem:[%s2330_s14 + $0x1b8] sm:$0xff]  ;;  %v1506_v59 = vpack.c.bf16 %v738_v52, %v736_v51 }
  0xcf   : > { %1443 = vmatpush1.bf16.msra.mxu0 %v1442_v50  ;;  %1497 = vmatprep.subr.bf16.mxu1 %v1496_v26  ;;  %v1504_v50 = vpack.c.bf16 %v739_v44, %v737_v43  ;;  %v608_v57 = vld [vmem:[%s2330_s14 + $0x1a8] sm:$0xff]  ;;  %v1466_v60 = vpack.c.bf16 %v605_v54, %v603_v49  ;;  %v607_v61 = vld [vmem:[%s2330_s14 + $0x1a0] sm:$0xff]  ;;  %v609_v2 = vld [vmem:[%s2330_s14 + $0x1b0] sm:$0xff] }
  0xd0   : > { %1445 = vmatprep.subr.bf16.mxu0 %v1444_v56  ;;  %v743_v56 = vld [vmem:[%s2338_s1 + $0xf8] sm:$0xff]  ;;  %v740_v63 = vld [vmem:[%s2338_s1 + $0xe0] sm:$0xff]  ;;  %v1468_v1 = vpack.c.bf16 %v610_v58, %v608_v57  ;;  %v745_v3 = vld [vmem:[%s2338_s1 + $0x108] sm:$0xff]  ;;  %v1470_v8 = vpack.c.bf16 %v609_v2, %v607_v61 }
  0xd1   : > { %v1508_v62 = vpack.c.bf16 %v743_v56, %v741_v55  ;;  %v747_v4 = vld [vmem:[%s2338_s1 + $0x118] sm:$0xff]  ;;  %v611_v9 = vld [vmem:[%s2330_s14 + $0x1c0] sm:$0xff]  ;;  %v613_v14 = vld [vmem:[%s2330_s14 + $0x1d0] sm:$0xff] }
  0xd2   : > { %1499 = vmatpush1.bf16.msra.mxu1 %v1498_v35  ;;  %v614_v6 = vld [vmem:[%s2330_s14 + $0x1d8] sm:$0xff]  ;;  %v1512_v10 = vpack.c.bf16 %v747_v4, %v745_v3  ;;  %v744_v11 = vld [vmem:[%s2338_s1 + $0x100] sm:$0xff]  ;;  %v749_v15 = vld [vmem:[%s2338_s1 + $0x128] sm:$0xff]  ;;  %v1474_v20 = vpack.c.bf16 %v613_v14, %v611_v9 }
  0xd3   : > { %1447 = vmatpush1.bf16.msra.mxu0 %v1446_v0  ;;  %1501 = vmatprep.subr.bf16.mxu1 %v1500_v38  ;;  %v742_v0 = vld [vmem:[%s2338_s1 + $0xf0] sm:$0xff]  ;;  %v751_v16 = vld [vmem:[%s2338_s1 + $0x138] sm:$0xff]  ;;  %v615_v21 = vld [vmem:[%s2330_s14 + $0x1e0] sm:$0xff] }
  0xd4   : > { %1449 = vmatprep.subr.bf16.mxu0 %v1448_v5  ;;  %v612_v5 = vld [vmem:[%s2330_s14 + $0x1c8] sm:$0xff]  ;;  %v1510_v7 = vpack.c.bf16 %v742_v0, %v740_v63  ;;  %v618_v18 = vld [vmem:[%s2330_s14 + $0x1f8] sm:$0xff]  ;;  %v1516_v22 = vpack.c.bf16 %v751_v16, %v749_v15  ;;  %v748_v23 = vld [vmem:[%s2338_s1 + $0x120] sm:$0xff] }
  0xd5   : > { %v1472_v13 = vpack.c.bf16 %v614_v6, %v612_v5  ;;  %v617_v26 = vld [vmem:[%s2330_s14 + $0x1f0] sm:$0xff]  ;;  %v753_v27 = vld [vmem:[%s2338_s1 + $0x148] sm:$0xff]  ;;  %v755_v28 = vld [vmem:[%s2338_s1 + $0x158] sm:$0xff] }
  0xd6   : > { %1503 = vmatpush1.bf16.msra.mxu1 %v1502_v47  ;;  %v1478_v30 = vpack.c.bf16 %v617_v26, %v615_v21  ;;  %v1520_v31 = vpack.c.bf16 %v755_v28, %v753_v27  ;;  %v752_v32 = vld [vmem:[%s2338_s1 + $0x140] sm:$0xff]  ;;  %v754_v33 = vld [vmem:[%s2338_s1 + $0x150] sm:$0xff]  ;;  %v757_v34 = vld [vmem:[%s2338_s1 + $0x168] sm:$0xff] }
  0xd7   : > { %1451 = vmatpush1.bf16.msra.mxu0 %v1450_v12  ;;  %1505 = vmatprep.subr.bf16.mxu1 %v1504_v50  ;;  %v746_v12 = vld [vmem:[%s2338_s1 + $0x110] sm:$0xff]  ;;  %v759_v35 = vld [vmem:[%s2338_s1 + $0x178] sm:$0xff]  ;;  %v551_v37 = vld [vmem:[%s2319_s22] sm:$0xff] }
  0xd8   : > { %1453 = vmatprep.subr.bf16.mxu0 %v1452_v17  ;;  %v616_v17 = vld [vmem:[%s2330_s14 + $0x1e8] sm:$0xff]  ;;  %v1514_v19 = vpack.c.bf16 %v746_v12, %v744_v11  ;;  %v1524_v38 = vpack.c.bf16 %v759_v35, %v757_v34  ;;  %v756_v39 = vld [vmem:[%s2338_s1 + $0x160] sm:$0xff]  ;;  %v758_v40 = vld [vmem:[%s2338_s1 + $0x170] sm:$0xff]  ;;  %s2797_s14 = sld [smem:[#allocation20_spill]] }
  0xd9   : > { %v1476_v25 = vpack.c.bf16 %v618_v18, %v616_v17  ;;  %v761_v42 = vld [vmem:[%s2338_s1 + $0x188] sm:$0xff]  ;;  %v763_v43 = vld [vmem:[%s2338_s1 + $0x198] sm:$0xff]  ;;  %v1526_v44 = vpack.c.bf16 %v758_v40, %v756_v39  ;;  %v553_v45 = vld [vmem:[%s2319_s22 + $0x10] sm:$0xff] }
  0xda   : > { %1507 = vmatpush1.bf16.msra.mxu1 %v1506_v59  ;;  %v1528_v46 = vpack.c.bf16 %v763_v43, %v761_v42  ;;  %v760_v47 = vld [vmem:[%s2338_s1 + $0x180] sm:$0xff]  ;;  %v765_v49 = vld [vmem:[%s2338_s1 + $0x1a8] sm:$0xff]  ;;  %v767_v50 = vld [vmem:[%s2338_s1 + $0x1b8] sm:$0xff] }
  0xdb   : > { %1455 = vmatpush1.bf16.msra.mxu0 %v1454_v24  ;;  %1509 = vmatprep.subr.bf16.mxu1 %v1508_v62  ;;  %v750_v24 = vld [vmem:[%s2338_s1 + $0x130] sm:$0xff]  ;;  %v1532_v52 = vpack.c.bf16 %v767_v50, %v765_v49  ;;  %v769_v55 = vld [vmem:[%s2338_s1 + $0x1c8] sm:$0xff]  ;;  %v771_v56 = vld [vmem:[%s2338_s1 + $0x1d8] sm:$0xff] }
  0xdc   : > { %1457 = vmatprep.subr.bf16.mxu0 %v1456_v29  ;;  %v1518_v29 = vpack.c.bf16 %v750_v24, %v748_v23  ;;  %v766_v54 = vld [vmem:[%s2338_s1 + $0x1b0] sm:$0xff]  ;;  %v1536_v58 = vpack.c.bf16 %v771_v56, %v769_v55  ;;  %v768_v59 = vld [vmem:[%s2338_s1 + $0x1c0] sm:$0xff]  ;;  %v773_v62 = vld [vmem:[%s2338_s1 + $0x1e8] sm:$0xff] }
  0xdd   : > { %v775_v63 = vld [vmem:[%s2338_s1 + $0x1f8] sm:$0xff]  ;;  %v774_v2 = vld [vmem:[%s2338_s1 + $0x1f0] sm:$0xff]  ;;  %v869_v6 = vld [vmem:[%s2479_s11] sm:$0xff] }
  0xde   : > { %1511 = vmatpush1.bf16.msra.mxu1 %v1510_v7  ;;  %v1540_v0 = vpack.c.bf16 %v775_v63, %v773_v62  ;;  %v870_v4 = vld [vmem:[%s2479_s11 + $0x8] sm:$0xff]  ;;  %v872_v5 = vld [vmem:[%s2479_s11 + $0x18] sm:$0xff]  ;;  %v875_v14 = vld [vmem:[%s2479_s11 + $0x30] sm:$0xff]  ;;  %p2799_p1 = scmp.ne.s32.totalorder %s2797_s14, 0 }
  0xdf   : > { %1459 = vmatpush1.bf16.msra.mxu0 %v1458_v36  ;;  %1513 = vmatprep.subr.bf16.mxu1 %v1512_v10  ;;  %v1522_v36 = vpack.c.bf16 %v754_v33, %v752_v32  ;;  %v1544_v7 = vpack.c.bf16 %v872_v5, %v870_v4  ;;  %v874_v9 = vld [vmem:[%s2479_s11 + $0x28] sm:$0xff]  ;;  %v876_v10 = vld [vmem:[%s2479_s11 + $0x38] sm:$0xff]  ;;  %v883_v26 = vld [vmem:[%s2479_s11 + $0x70] sm:$0xff] }
  0xe0   : > { %1461 = vmatprep.subr.bf16.mxu0 %v1460_v41  ;;  %v554_v41 = vld [vmem:[%s2319_s22 + $0x18] sm:$0xff]  ;;  %v2489_v12 = vpack.c.bf16 %v876_v10, %v874_v9  ;;  %v878_v15 = vld [vmem:[%s2479_s11 + $0x48] sm:$0xff]  ;;  %v893_v43 = vld [vmem:[%s2479_s11 + $0xc0] sm:$0xff] }
  0xe1   : > { %v880_v16 = vld [vmem:[%s2479_s11 + $0x58] sm:$0xff]  ;;  %v882_v21 = vld [vmem:[%s2479_s11 + $0x68] sm:$0xff]  ;;  %v887_v32 = vld [vmem:[%s2479_s11 + $0x90] sm:$0xff] }
  0xe2   : > { %1515 = vmatpush1.bf16.msra.mxu1 %v1514_v19  ;;  %v2499_v18 = vpack.c.bf16 %v880_v16, %v878_v15  ;;  %v877_v19 = vld [vmem:[%s2479_s11 + $0x40] sm:$0xff]  ;;  %v886_v27 = vld [vmem:[%s2479_s11 + $0x88] sm:$0xff]  ;;  %v888_v28 = vld [vmem:[%s2479_s11 + $0x98] sm:$0xff] }
  0xe3   : > { %1463 = vmatpush1.bf16.msra.mxu0 %v1462_v48  ;;  %1517 = vmatprep.subr.bf16.mxu1 %v1516_v22  ;;  %v762_v48 = vld [vmem:[%s2338_s1 + $0x190] sm:$0xff]  ;;  %v884_v22 = vld [vmem:[%s2479_s11 + $0x78] sm:$0xff]  ;;  %v897_v49 = vld [vmem:[%s2479_s11 + $0xe0] sm:$0xff] }
  0xe4   : > { %1465 = vmatprep.subr.bf16.mxu0 %v1464_v53  ;;  %v1530_v51 = vpack.c.bf16 %v762_v48, %v760_v47  ;;  %v764_v53 = vld [vmem:[%s2338_s1 + $0x1a0] sm:$0xff]  ;;  %v2509_v24 = vpack.c.bf16 %v884_v22, %v882_v21  ;;  %v890_v33 = vld [vmem:[%s2479_s11 + $0xa8] sm:$0xff]  ;;  %v899_v50 = vld [vmem:[%s2479_s11 + $0xf0] sm:$0xff] }
  0xe5   : > { %v1534_v57 = vpack.c.bf16 %v766_v54, %v764_v53  ;;  %v892_v34 = vld [vmem:[%s2479_s11 + $0xb8] sm:$0xff]  ;;  %v894_v39 = vld [vmem:[%s2479_s11 + $0xc8] sm:$0xff]  ;;  %v2556_v53 = vpack.c.bf16 %v899_v50, %v897_v49  ;;  %v901_v55 = vld [vmem:[%s2479_s11 + $0x100] sm:$0xff] }
  0xe6   : > { %1519 = vmatpush1.bf16.msra.mxu1 %v1518_v29  ;;  %v896_v40 = vld [vmem:[%s2479_s11 + $0xd8] sm:$0xff]  ;;  %v903_v56 = vld [vmem:[%s2479_s11 + $0x110] sm:$0xff]  ;;  %v910_v63 = vld [vmem:[%s2479_s11 + $0x148] sm:$0xff] }
  0xe7   : > { %1467 = vmatpush1.bf16.msra.mxu0 %v1466_v60  ;;  %1521 = vmatprep.subr.bf16.mxu1 %v1520_v31  ;;  %v770_v60 = vld [vmem:[%s2338_s1 + $0x1d0] sm:$0xff]  ;;  %v885_v31 = vld [vmem:[%s2479_s11 + $0x80] sm:$0xff]  ;;  %v2539_v42 = vpack.c.bf16 %v896_v40, %v894_v39  ;;  %v924_v22 = vld [vmem:[%s2479_s11 + $0x1b8] sm:$0xff] }
  0xe8   : > { %1469 = vmatprep.subr.bf16.mxu0 %v1468_v1  ;;  %v1538_v61 = vpack.c.bf16 %v770_v60, %v768_v59  ;;  %v772_v1 = vld [vmem:[%s2338_s1 + $0x1e0] sm:$0xff]  ;;  %v2526_v35 = vpack.c.bf16 %v887_v32, %v885_v31  ;;  %v2566_v59 = vpack.c.bf16 %v903_v56, %v901_v55  ;;  %v907_v62 = vld [vmem:[%s2479_s11 + $0x130] sm:$0xff]  ;;  %v914_v5 = vld [vmem:[%s2479_s11 + $0x168] sm:$0xff]  ;;  %s1161_s1 = sshll.u32 %s535_s13, 4  ;;  %s2698_s1 = int_to_ptr.vmem [resolvable:$true] %s1161_s1 }
  0xe9   : > { %v1542_v3 = vpack.c.bf16 %v774_v2, %v772_v1  ;;  %v911_v4 = vld [vmem:[%s2479_s11 + $0x150] sm:$0xff]  ;;  %v913_v9 = vld [vmem:[%s2479_s11 + $0x160] sm:$0xff]  ;;  %v922_v21 = vld [vmem:[%s2479_s11 + $0x1a8] sm:$0xff]  ;;  %s1896_s20 = scalar_lea.vmem %s2698_s1, 512  ;;  %p1903_p5 = scmp.lt.s32.totalorder %s2698_s1, %s1901_s18 }
  0xea   : > { %1523 = vmatpush1.bf16.msra.mxu1 %v1522_v36  ;;  %v2529_v36 = vpack.c.bf16 %v892_v34, %v890_v33  ;;  %v915_v10 = vld [vmem:[%s2479_s11 + $0x170] sm:$0xff]  ;;  %v926_v31 = vld [vmem:[%s2479_s11 + $0x1c8] sm:$0xff]  ;;  %v928_v32 = vld [vmem:[%s2479_s11 + $0x1d8] sm:$0xff]  ;;  %p1897_p11 = scmp.ne.s32.totalorder %s2698_s1, %s1896_s20  ;;  %p1904_p8 = scmp.lt.s32.totalorder %s1902_s25, %s1896_s20 }
  0xeb   : > { %1471 = vmatpush1.bf16.msra.mxu0 %v1470_v8  ;;  %1525 = vmatprep.subr.bf16.mxu1 %v1524_v38  ;;  %v871_v8 = vld [vmem:[%s2479_s11 + $0x10] sm:$0xff]  ;;  %v2596_v15 = vpack.c.bf16 %v915_v10, %v913_v9  ;;  %v1600_v34 = vpack.c.bf16 %v928_v32, %v926_v31  ;;  %v619_v40 = vld [vmem:[%s540_s24] sm:$0x3] }
  0xec   : > { %1473 = vmatprep.subr.bf16.mxu0 %v1472_v13  ;;  %v2487_v11 = vpack.c.bf16 %v871_v8, %v869_v6  ;;  %v873_v13 = vld [vmem:[%s2479_s11 + $0x20] sm:$0xff]  ;;  %v891_v38 = vld [vmem:[%s2479_s11 + $0xb0] sm:$0xff]  ;;  %v916_v6 = vld [vmem:[%s2479_s11 + $0x178] sm:$0xff]  ;;  %p1898_p3 = pnand %p1897_p11, %p2799_p1  ;;  %p1905_p9 = por %p1904_p8, %p1903_p5 }
  0xed   : > { %v2496_v17 = vpack.c.bf16 %v875_v14, %v873_v13  ;;  %v2589_v8 = vpack.c.bf16 %v916_v6, %v914_v5  ;;  %v918_v13 = vld [vmem:[%s2479_s11 + $0x188] sm:$0xff]  ;;  %v920_v14 = vld [vmem:[%s2479_s11 + $0x198] sm:$0xff] }
  0xee   : > { %1527 = vmatpush1.bf16.msra.mxu1 %v1526_v44  ;;  %v895_v44 = vld [vmem:[%s2479_s11 + $0xd0] sm:$0xff]  ;;  %v2599_v16 = vpack.c.bf16 %v920_v14, %v918_v13  ;;  %v933_v6 = vld [vmem:[%s544_s26] sm:$0x3]  ;;  %p1899_p7 = pneg %p1898_p3 }
  0xef   : > { %1475 = vmatpush1.bf16.msra.mxu0 %v1474_v20  ;;  %1529 = vmatprep.subr.bf16.mxu1 %v1528_v46  ;;  %v879_v20 = vld [vmem:[%s2479_s11 + $0x50] sm:$0xff]  ;;  %v900_v46 = vld [vmem:[%s2479_s11 + $0xf8] sm:$0xff]  ;;  %v2546_v47 = vpack.c.bf16 %v895_v44, %v893_v43 }
  0xf0   : > { %1477 = vmatprep.subr.bf16.mxu0 %v1476_v25  ;;  %v2506_v23 = vpack.c.bf16 %v879_v20, %v877_v19  ;;  %v881_v25 = vld [vmem:[%s2479_s11 + $0x60] sm:$0xff]  ;;  %v919_v20 = vld [vmem:[%s2479_s11 + $0x190] sm:$0xff]  ;;  %p1906_p6 = pnand %p1905_p9, %p1899_p7 }
  0xf1   : > { %v2516_v29 = vpack.c.bf16 %v883_v26, %v881_v25  ;;  %v917_v19 = vld [vmem:[%s2479_s11 + $0x180] sm:$0xff]  ;;  %v1596_v26 = vpack.c.bf16 %v924_v22, %v922_v21 }
  0xf2   : > { %1531 = vmatpush1.bf16.msra.mxu1 %v1530_v51  ;;  %v902_v51 = vld [vmem:[%s2479_s11 + $0x108] sm:$0xff]  ;;  %v2606_v25 = vpack.c.bf16 %v919_v20, %v917_v19 }
  0xf3   : > { %1479 = vmatpush1.bf16.msra.mxu0 %v1478_v30  ;;  %1533 = vmatprep.subr.bf16.mxu1 %v1532_v52  ;;  %v2519_v30 = vpack.c.bf16 %v888_v28, %v886_v27  ;;  %v904_v52 = vld [vmem:[%s2479_s11 + $0x118] sm:$0xff]  ;;  %v921_v27 = vld [vmem:[%s2479_s11 + $0x1a0] sm:$0xff]  ;;  %v923_v28 = vld [vmem:[%s2479_s11 + $0x1b0] sm:$0xff] }
  0xf4   : > { %1545 = vmatprep.subr.bf16.mxu0 %v1544_v7  ;;  %v2559_v54 = vpack.c.bf16 %v904_v52, %v902_v51  ;;  %v1598_v33 = vpack.c.bf16 %v923_v28, %v921_v27 }
  0xf6   : > { %696 = vmatmul.mubr.f32.vlgmr.msra.gmra.mrb[0].mxu0 %v551_v37  ;;  %1535 = vmatpush1.bf16.msra.mxu1 %v1534_v57  ;;  %v889_v37 = vld [vmem:[%s2479_s11 + $0xa0] sm:$0xff]  ;;  %v906_v57 = vld [vmem:[%s2479_s11 + $0x128] sm:$0xff] }
  0xf7   : > { %701 = vmatprep.mubr.f32.mxu0 %v554_v41  ;;  %1537 = vmatprep.subr.bf16.mxu1 %v1536_v58  ;;  %v2536_v41 = vpack.c.bf16 %v891_v38, %v889_v37  ;;  %v908_v58 = vld [vmem:[%s2479_s11 + $0x138] sm:$0xff]  ;;  %v621_v37 = vlaneseq }
  0xf8   : > { %1547 = vmatpush1.bf16.msra.mxu0 %v2487_v11  ;;  %v2569_v60 = vpack.c.bf16 %v908_v58, %v906_v57 }
  0xf9   : > { %1549 = vmatprep.subr.bf16.mxu0 %v2489_v12  ;;  %v2619_v38 = vshrl.u32 %v621_v37, 7 }
  0xfa   : > { %702 = vmatmul.mubr.f32.gmra.mrb[2].mxu0 %v553_v45  ;;  %1539 = vmatpush1.bf16.msra.mxu1 %v1538_v61  ;;  %v898_v45 = vld [vmem:[%s2479_s11 + $0xe8] sm:$0xff]  ;;  %v905_v61 = vld [vmem:[%s2479_s11 + $0x120] sm:$0xff] }
  0xfb   : > { %1541 = vmatprep.subr.bf16.mxu1 %v1540_v0  ;;  %v2549_v48 = vpack.c.bf16 %v900_v46, %v898_v45  ;;  %v912_v0 = vld [vmem:[%s2479_s11 + $0x158] sm:$0xff]  ;;  %v2576_v1 = vpack.c.bf16 %v907_v62, %v905_v61  ;;  %v2627_v39 = vsub.s32 0, %v2619_v38  ;;  %v2630_v43 = vsub.s32 1, %v2619_v38 }
  0xfc   : > { %1551 = vmatpush1.bf16.msra.mxu0 %v2496_v17  ;;  %v2579_v2 = vpack.c.bf16 %v912_v0, %v910_v63 }
  0xfd   : > { %1553 = vmatprep.subr.bf16.mxu0 %v2499_v18  ;;  %v624_v44 = vrot.slane %v619_v40, %v2627_v39  ;;  %v628_v45 = vrot.slane %v619_v40, %v2630_v43 }
  0xfe   : > { %1543 = vmatpush1.bf16.msra.mxu1 %v1542_v3  ;;  %v909_v3 = vld [vmem:[%s2479_s11 + $0x140] sm:$0xff] }
  0xff   : > { %1608 = vmatprep.subr.bf16.mxu1 %v1544_v7  ;;  %v2586_v7 = vpack.c.bf16 %v911_v4, %v909_v3 }
 0x100   : > { %1555 = vmatpush1.bf16.msra.mxu0 %v2506_v23 }
 0x101   : > { %1557 = vmatprep.subr.bf16.mxu0 %v2509_v24 }
 0x104   : > { %1559 = vmatpush1.bf16.msra.mxu0 %v2516_v29 }
 0x105   : > { %1561 = vmatprep.subr.bf16.mxu0 %v2519_v30 }
 0x108   : > { %1563 = vmatpush1.bf16.msra.mxu0 %v2526_v35 }
 0x109   : > { %1565 = vmatprep.subr.bf16.mxu0 %v2529_v36 }
 0x10c   : > { %1567 = vmatpush1.bf16.msra.mxu0 %v2536_v41 }
 0x10d   : > { %1569 = vmatprep.subr.bf16.mxu0 %v2539_v42 }
 0x110   : > { %1571 = vmatpush1.bf16.msra.mxu0 %v2546_v47 }
 0x111   : > { %1573 = vmatprep.subr.bf16.mxu0 %v2549_v48 }
 0x114   : > { %1575 = vmatpush1.bf16.msra.mxu0 %v2556_v53 }
 0x115   : > { %1577 = vmatprep.subr.bf16.mxu0 %v2559_v54 }
 0x118   : > { %1579 = vmatpush1.bf16.msra.mxu0 %v2566_v59 }
 0x119   : > { %1581 = vmatprep.subr.bf16.mxu0 %v2569_v60 }
 0x11c   : > { %1583 = vmatpush1.bf16.msra.mxu0 %v2576_v1 }
 0x11d   : > { %1585 = vmatprep.subr.bf16.mxu0 %v2579_v2 }
 0x120   : > { %1587 = vmatpush1.bf16.msra.mxu0 %v2586_v7 }
 0x121   : > { %1589 = vmatprep.subr.bf16.mxu0 %v2589_v8 }
 0x124   : > { %1591 = vmatpush1.bf16.msra.mxu0 %v2596_v15 }
 0x125   : > { %1593 = vmatprep.subr.bf16.mxu0 %v2599_v16 }
 0x128   : > { %1595 = vmatpush1.bf16.msra.mxu0 %v2606_v25 }
 0x129   : > { %1597 = vmatprep.subr.bf16.mxu0 %v1596_v26 }
 0x12c   : > { %1599 = vmatpush1.bf16.msra.mxu0 %v1598_v33 }
 0x12d   : > { %1601 = vmatprep.subr.bf16.mxu0 %v1600_v34 }
 0x1c9   : > { %v697_v46 = vpop.f32.mrb[0].mxu0 }
 0x1ca   : > { %v698_v49 = vadd.f32 %v697_v46, %v624_v44  ;;  %v699_v50 = vpop.f32.mrb[1].mxu0 }
 0x1cb   : > { %v700_v51 = vadd.f32 %v699_v50, %v628_v45 }
 0x1cc   : > { %v708_v56 = vmax.f32 %v698_v49, 0.0 }
 0x1cd   : > { %v703_v52 = vpop.f32.mrb[2].mxu0  ;;  %v709_v55 = vmax.f32 %v700_v51, 0.0 }
 0x1ce   : > { %v704_v57 = vadd.f32 %v703_v52, %v624_v44  ;;  %v705_v58 = vpop.f32.mrb[3].mxu0  ;;  %v1062_v52 = vld [vmem:[%s549_s12] sm:$0xf] }
 0x1cf   : > { %v706_v61 = vadd.f32 %v705_v58, %v628_v45  ;;  %852 = vmatprep.mubr.f32.mxu1 %v709_v55  ;;  %v1096_v58 = vsub.s32 3, %v2619_v38 }
 0x1d0   : > { %853 = vmatmul.mubr.f32.vlgmr.msra.gmra.mrb[0].mxu1 %v708_v56  ;;  %v710_v63 = vmax.f32 %v704_v57, 0.0  ;;  %v1112_v57 = vsub.f32 1.0, %v1062_v52 }
 0x1d1   : > { %v711_v62 = vmax.f32 %v706_v61, 0.0  ;;  %1624 = vmatpush1.bf16.msra.mxu1 %v2487_v11  ;;  %v925_v11 = vld [vmem:[%s2479_s11 + $0x1c0] sm:$0xff]  ;;  %v1070_v61 = vsub.s32 2, %v2619_v38 }
 0x1d2   : > { %1609 = vmatprep.subr.bf16.mxu1 %v2489_v12  ;;  %v927_v12 = vld [vmem:[%s2479_s11 + $0x1d0] sm:$0xff] }
 0x1d3   : > { %858 = vmatprep.mubr.f32.mxu1 %v711_v62  ;;  %v1067_v62 = vrot.slane %v1062_v52, %v2627_v39 }
 0x1d4   : > { %859 = vmatmul.mubr.f32.gmra.mrb[2].mxu1 %v710_v63  ;;  %v1117_v63 = vrot.slane %v1112_v57, %v2630_v43 }
 0x1d5   : > { %1625 = vmatpush1.bf16.msra.mxu1 %v2496_v17  ;;  %v1602_v17 = vpack.c.bf16 %v927_v12, %v925_v11  ;;  %v1071_v12 = vrot.slane %v1062_v52, %v1070_v61 }
 0x1d6   : > { %1610 = vmatprep.subr.bf16.mxu1 %v2499_v18  ;;  %v930_v18 = vld [vmem:[%s2479_s11 + $0x1e8] sm:$0xff] }
 0x1d7   : > { %1603 = vmatpush1.bf16.msra.mxu0 %v1602_v17 }
 0x1d9   : > { %1626 = vmatpush1.bf16.msra.mxu1 %v2506_v23  ;;  %v932_v23 = vld [vmem:[%s2479_s11 + $0x1f8] sm:$0xff] }
 0x1da   : > { %1611 = vmatprep.subr.bf16.mxu1 %v2509_v24  ;;  %v1604_v24 = vpack.c.bf16 %v932_v23, %v930_v18 }
 0x1dc   : > { %1605 = vmatprep.subr.bf16.mxu0 %v1604_v24 }
 0x1dd   : > { %1627 = vmatpush1.bf16.msra.mxu1 %v2516_v29  ;;  %v929_v29 = vld [vmem:[%s2479_s11 + $0x1e0] sm:$0xff] }
 0x1de   : > { %1612 = vmatprep.subr.bf16.mxu1 %v2519_v30  ;;  %v931_v30 = vld [vmem:[%s2479_s11 + $0x1f0] sm:$0xff]  ;;  %s2798_s11 = sld [smem:[#allocation24_spill]] }
 0x1e1   : > { %1628 = vmatpush1.bf16.msra.mxu1 %v2526_v35  ;;  %v1606_v35 = vpack.c.bf16 %v931_v30, %v929_v29  ;;  %v1093_v29 = vrot.slane %v1062_v52, %v2630_v43 }
 0x1e2   : > { %1613 = vmatprep.subr.bf16.mxu1 %v2529_v36  ;;  %v776_v36 = vld [vmem:[%s2340_s15] sm:$0x3] }
 0x1e3   : > { %1607 = vmatpush1.bf16.msra.mxu0 %v1606_v35 }
 0x1e4   : > { %s2696_s17 = scalar_lea.hbm %s2798_s11, %s1415_s23 }
 0x1e5   : > { %1629 = vmatpush1.bf16.msra.mxu1 %v2536_v41  ;;  %v781_v41 = vrot.slane %v776_v36, %v2627_v39 }
 0x1e6   : > { %1614 = vmatprep.subr.bf16.mxu1 %v2539_v42  ;;  %v785_v42 = vrot.slane %v776_v36, %v2630_v43  ;;  %v1127_v36 = vrot.slane %v1117_v63, %v2630_v43 }
 0x1e9   : > { %1630 = vmatpush1.bf16.msra.mxu1 %v2546_v47 }
 0x1ea   : > { %1615 = vmatprep.subr.bf16.mxu1 %v2549_v48 }
 0x1ed   : > { %1631 = vmatpush1.bf16.msra.mxu1 %v2556_v53 }
 0x1ee   : > { %1616 = vmatprep.subr.bf16.mxu1 %v2559_v54 }
 0x1f1   : > { %1632 = vmatpush1.bf16.msra.mxu1 %v2566_v59 }
 0x1f2   : > { %1617 = vmatprep.subr.bf16.mxu1 %v2569_v60 }
 0x1f5   : > { %1633 = vmatpush1.bf16.msra.mxu1 %v2576_v1 }
 0x1f6   : > { %1618 = vmatprep.subr.bf16.mxu1 %v2579_v2 }
 0x1f9   : > { %1634 = vmatpush1.bf16.msra.mxu1 %v2586_v7  ;;  %v938_v7 = vrot.slane %v933_v6, %v2627_v39 }
 0x1fa   : > { %1619 = vmatprep.subr.bf16.mxu1 %v2589_v8  ;;  %v942_v8 = vrot.slane %v933_v6, %v2630_v43 }
 0x1fd   : > { %1635 = vmatpush1.bf16.msra.mxu1 %v2596_v15 }
 0x1fe   : > { %1620 = vmatprep.subr.bf16.mxu1 %v2599_v16 }
 0x201   : > { %1636 = vmatpush1.bf16.msra.mxu1 %v2606_v25 }
 0x202   : > { %1621 = vmatprep.subr.bf16.mxu1 %v1596_v26 }
 0x205   : > { %1637 = vmatpush1.bf16.msra.mxu1 %v1598_v33 }
 0x206   : > { %1622 = vmatprep.subr.bf16.mxu1 %v1600_v34 }
 0x209   : > { %1638 = vmatpush1.bf16.msra.mxu1 %v1602_v17  ;;  %v1121_v17 = vrot.slane %v1112_v57, %v1096_v58 }
 0x20a   : > { %1623 = vmatprep.subr.bf16.mxu1 %v1604_v24 }
 0x20d   : > { %1639 = vmatpush1.bf16.msra.mxu1 %v1606_v35  ;;  %v1077_v35 = vrot.slane %v1067_v62, %v2627_v39 }
 0x2a3   : > { %v854_v47 = vpop.f32.mrb[0].mxu1 }
 0x2a4   : > { %v855_v48 = vadd.f32 %v854_v47, %v781_v41  ;;  %v856_v53 = vpop.f32.mrb[1].mxu1  ;;  %v1081_v47 = vrot.slane %v1071_v12, %v2627_v39 }
 0x2a5   : > { %v857_v54 = vadd.f32 %v856_v53, %v785_v42 }
 0x2a6   : > { %v865_v0 = vmax.f32 %v855_v48, 0.0  ;;  %v1131_v48 = vrot.slane %v1121_v17, %v2630_v43 }
 0x2a7   : > { %v866_v59 = vmax.f32 %v857_v54, 0.0  ;;  %v860_v60 = vpop.f32.mrb[2].mxu1 }
 0x2a8   : > { %v861_v1 = vadd.f32 %v860_v60, %v781_v41  ;;  %v862_v2 = vpop.f32.mrb[3].mxu1 }
 0x2a9   : > { %v863_v3 = vadd.f32 %v862_v2, %v785_v42  ;;  %1009 = vmatprep.mubr.f32.mxu0 %v866_v59  ;;  %v1097_v42 = vrot.slane %v1062_v52, %v1096_v58  ;;  %v1103_v2 = vrot.slane %v1093_v29, %v2630_v43 }
 0x2aa   : > { %1010 = vmatmul.mubr.f32.vlgmr.msra.gmra.mrb[4].mxu0 %v865_v0  ;;  %v867_v5 = vmax.f32 %v861_v1, 0.0 }
 0x2ab   : > { %v868_v4 = vmax.f32 %v863_v3, 0.0  ;;  %v1107_v6 = vrot.slane %v1097_v42, %v2630_v43 }
 0x2ad   : > { %1015 = vmatprep.mubr.f32.mxu1 %v868_v4 }
 0x2ae   : > { %1016 = vmatmul.mubr.f32.vlgmr.msra.gmra.mrb[4].mxu1 %v867_v5 }
 0x37d   : > { %v1011_v9 = vpop.f32.mrb[4].mxu0 }
 0x37e   : > { %v1012_v10 = vadd.f32 %v1011_v9, %v938_v7  ;;  %v1013_v13 = vpop.f32.mrb[5].mxu0 }
 0x37f   : > { %v1014_v14 = vadd.f32 %v1013_v13, %v942_v8 }
 0x380   : > { %v1400_v15 = vclamps-f32 %v1012_v10, 30.0 }
 0x381   : > { %v1401_v16 = vclamps-f32 %v1014_v14, 30.0  ;;  %v1017_v19 = vpop.f32.mrb[4].mxu1 }
 0x382   : > { %v1030_v20 = vsub.f32 0.0, %v1400_v15  ;;  %v1018_v21 = vadd.f32 %v1017_v19, %v938_v7  ;;  %v1019_v22 = vpop.f32.mrb[5].mxu1 }
 0x383   : > { %v1031_v25 = vsub.f32 0.0, %v1401_v16  ;;  %v1020_v26 = vadd.f32 %v1019_v22, %v942_v8 }
 0x384   : > { %v1034_v27 = vmul.f32 1.442695, %v1030_v20  ;;  %v1402_v28 = vclamps-f32 %v1018_v21, 30.0 }
 0x385   : > { %v1036_v31 = vmul.f32 1.442695, %v1031_v25  ;;  %v1403_v32 = vclamps-f32 %v1020_v26, 30.0 }
 0x386   : > { %1730 = vpow2.f32 %v1034_v27  ;;  %v1032_v33 = vsub.f32 0.0, %v1402_v28 }
 0x387   : > { %1732 = vpow2.f32 %v1036_v31  ;;  %v1033_v34 = vsub.f32 0.0, %v1403_v32 }
 0x388   : > { %v1038_v37 = vmul.f32 1.442695, %v1032_v33 }
 0x389   : > { %v1040_v40 = vmul.f32 1.442695, %v1033_v34 }
 0x38a   : > { %1734 = vpow2.f32 %v1038_v37 }
 0x38b   : > { %1736 = vpow2.f32 %v1040_v40 }
 0x390   : > { %v1731_v44 = vpop.eup %1730 }
 0x391   : > { %v1733_v45 = vpop.eup %1732  ;;  %v1042_v46 = vadd.f32 1.0, %v1731_v44 }
 0x392   : > { %v1043_v49 = vadd.f32 1.0, %v1733_v45 }
 0x393   : > { %1738 = vrcp.f32 %v1042_v46 }
 0x394   : > { %v1735_v50 = vpop.eup %1734  ;;  %1740 = vrcp.f32 %v1043_v49 }
 0x395   : > { %v1737_v51 = vpop.eup %1736  ;;  %v1044_v55 = vadd.f32 1.0, %v1735_v50 }
 0x396   : > { %v1045_v56 = vadd.f32 1.0, %v1737_v51 }
 0x397   : > { %1742 = vrcp.f32 %v1044_v55 }
 0x398   : > { %1744 = vrcp.f32 %v1045_v56 }
 0x39d   : > { %v1739_v11 = vpop.eup %1738 }
 0x39e   : > { %v1741_v18 = vpop.eup %1740  ;;  %v1050_v23 = vmul.f32 %v1739_v11, %v1042_v46 }
 0x39f   : > { %v1051_v24 = vmul.f32 %v1741_v18, %v1043_v49 }
 0x3a0   : > { %v1054_v30 = vsub.f32 2.0, %v1050_v23 }
 0x3a1   : > { %v1743_v41 = vpop.eup %1742  ;;  %v1055_v38 = vsub.f32 2.0, %v1051_v24 }
 0x3a2   : > { %v1745_v53 = vpop.eup %1744  ;;  %v1058_v54 = vmul.f32 %v1739_v11, %v1054_v30  ;;  %v1052_v59 = vmul.f32 %v1743_v41, %v1044_v55 }
 0x3a3   : > { %v1059_v60 = vmul.f32 %v1741_v18, %v1055_v38  ;;  %v1053_v0 = vmul.f32 %v1745_v53, %v1045_v56 }
 0x3a4   : > { %v1082_v1 = vmul.f32 %v1077_v35, %v1058_v54  ;;  %v1132_v3 = vmul.f32 %v1127_v36, %v1058_v54  ;;  %v1056_v4 = vsub.f32 2.0, %v1052_v59 }
 0x3a5   : > { %v1083_v5 = vmul.f32 %v1081_v47, %v1059_v60  ;;  %v1133_v7 = vmul.f32 %v1131_v48, %v1059_v60  ;;  %v1057_v8 = vsub.f32 2.0, %v1053_v0 }
 0x3a6   : > { %v1640_v39 = vround.rtne.f32 %v1082_v1  ;;  %v1060_v9 = vmul.f32 %v1743_v41, %v1056_v4 }
 0x3a7   : > { %v1641_v10 = vround.rtne.f32 %v1083_v5  ;;  %v1061_v13 = vmul.f32 %v1745_v53, %v1057_v8 }
 0x3a8   : > { %v1108_v14 = vmul.f32 %v1640_v39, %v1103_v2  ;;  %v1084_v15 = vmul.f32 %v1077_v35, %v1060_v9  ;;  %v1134_v16 = vmul.f32 %v1127_v36, %v1060_v9 }
 0x3a9   : > { %v1109_v19 = vmul.f32 %v1641_v10, %v1107_v6  ;;  %v1085_v20 = vmul.f32 %v1081_v47, %v1061_v13  ;;  %v1135_v21 = vmul.f32 %v1131_v48, %v1061_v13 }
 0x3aa   : > { %v1136_v22 = vadd.f32 %v1132_v3, %v1108_v14  ;;  %v1642_v25 = vround.rtne.f32 %v1084_v15 }
 0x3ab   : > { %v1137_v26 = vadd.f32 %v1133_v7, %v1109_v19  ;;  %v1643_v27 = vround.rtne.f32 %v1085_v20 }
 0x3ac   : > { %1140 = vst [vmem:[%s535_s13] sm:$0xff] %v1136_v22  ;;  %v1110_v43 = vmul.f32 %v1642_v25, %v1103_v2 }
 0x3ad   : > { %1141 = vst [vmem:[%s535_s13 + $0x8] sm:$0xff] %v1137_v26  ;;  %v1111_v28 = vmul.f32 %v1643_v27, %v1107_v6 }
 0x3ae   : > { %v1138_v31 = vadd.f32 %v1134_v16, %v1110_v43 }
 0x3af   : > { %v1139_v32 = vadd.f32 %v1135_v21, %v1111_v28 }
 0x3b0   : > { %1142 = vst [vmem:[%s535_s13 + $0x10] sm:$0xff] %v1138_v31 }
 0x3b1   : > { %1143 = vst [vmem:[%s535_s13 + $0x18] sm:$0xff] %v1139_v32 }
 0x3b2   : > { %1909 = shalt.err (!%p1906_p6)
}
 0x3b3   : > { %s1910_s24 = scalar_lea.hbm %s2696_s17, 512  ;;  %s1914_s26 = scalar_lea.hbm %s2798_s11, 1024 }
 0x3b4   : > { %p1911_p12 = scmp.ne.s32.totalorder %s2696_s17, %s1910_s24  ;;  %p1915_p2 = scmp.lt.u32.totalorder %s2696_s17, %s2798_s11 }
 0x3b5   : > { %p1916_p4 = scmp.lt.u32.totalorder %s1914_s26, %s1910_s24  ;;  %p1918_p11 = scmp.lt.u32.totalorder %s1910_s24, %s2696_s17 }
 0x3b6   : > { %p1912_p10 = pnand %p1911_p12, %p2799_p1 }
 0x3b7   : > { %p1917_p13 = por %p1916_p4, %p1915_p2 }
 0x3b8   : > { %p1913_p0 = pneg %p1912_p10 }
 0x3b9   : > { %p1919_p3 = por %p1918_p11, %p1917_p13 }
 0x3bb   : > { %p1920_p7 = pnand %p1919_p3, %p1913_p0 }
 0x3bd   : > { %1923 = shalt.err (!%p1920_p7)
}
 0x3be   : > { %s1996_s16 = smov 256   ;;  %s1997_s12 = smov 16  }
 0x3bf   : > { %1654 = dma.vmem_to_hbm [thread:$0]  (%p2799_p1), %s2698_s1, 512, %s2696_s17, %s1145_s30, %s1996_s16, %s1996_s16, %s1997_s12  }
 0x3c0 PF: > { %s2800_s23 = sld [smem:[#allocation16_spill]]  ;;  %s2801_s13 = sld [smem:[#allocation22_spill]] }
 0x3c1   : > { %s2802_s27 = sld [smem:[#allocation18_spill]] }
 0x3c6   : > { %s1176_s15 = sand.u32 1, %s2800_s23   ;;  %p2803_p5 = scmp.ne.s32.totalorder %s2801_s13, 0 }
 0x3c7   : > { %p2804_p8 = scmp.ge.s32.totalorder %s2802_s27, 2  ;;  %s1177_s20 = scalar_lea.sflag [#allocation4], %s1176_s15 }
 0x3c9   : > { %p1673_p9 = pnand %p2804_p8, %p2803_p5 }
 0x3cb   : > { %1961 = dma.done.wait (!%p1673_p9), %s1177_s20, 512  }
 0x3cc   : > { %1963 = vsyncadd (!%p1673_p9), %s1177_s20, 4294966784  ;;  %s30_s10 = sadd.s32 1, %s2802_s27   ;;  %s2805_s19 = sld [smem:[#allocation17_spill]] }
 0x3cd   : > { %p27_p6 = scmp.ge.s32.totalorder %s30_s10, 4   ;;  %s2806_s29 = sld [smem:[#allocation21_spill]] }
 0x3ce   : > { %s2807_s14 = sld [smem:[#allocation19_spill]]  ;;  %s2808_s27 = smov %s1970_s28 }
 0x3cf   : > { %s2810_s30 = smov %s1982_s9  ;;  %29 = sbr.rel (!%p27_p6) target bundleno = 13 (0xd), region = 154 }
 0x3d2   : > { %s2809_s28 = smov %s2805_s19 }
 0x3d4   : > { %s2811_s9 = smov %s2807_s14 }
 0x3d6   :  { %1182 = vsyncpa [#allocation3], 1 }
 0x3d7   :  { %1184 = vsyncpa [#allocation3 + $0x1], 1 }
 0x3d8   :  { %1185 = vsyncpa [#allocation6], 1 }
 0x3d9   :  { %1187 = vsyncpa [#allocation6 + $0x1], 1 }
 0x3da   :  { %1188 = vsyncpa [#allocation9], 1 }
 0x3db   :  { %1190 = vsyncpa [#allocation9 + $0x1], 1 }
 0x3dc   :  { %1191 = vsyncpa [#allocation4], 1 }
 0x3dd   :  { %1193 = vsyncpa [#allocation4 + $0x1], 1 }

</bundles_post_ra>
